<compile_context>
chip_gen: v7x
topology: tpu7x:2x2x1
jax: 0.10.0
libtpu: 0.0.40
codegen_flags: <defaults>
</compile_context>

<pallas_src>
import math

import jax
import jax.numpy as jnp
from jax.experimental import pallas as pl
from jax.experimental.pallas import tpu as pltpu


def _cdiv(a, b):
    return -(-a // b)


def _round_up(x, m):
    return ((x + m - 1) // m) * m


def glorep_reduce_kernel(doc_ref, r_ref, out_ref):
    """One grid step: reduce TG grouped rows (each holding G flattened (Q, D)
    slices) over Q with a single MXU matmul.

    doc_ref : (TG, G*Q*D)  lane-dense block of grouped, flattened slices
    r_ref   : (G*Q*D, G*D) constant 0/1 block-diagonal reduction matrix
    out_ref : (TG, G*D)    per-slice sums over Q, G slices side by side
    """
    out_ref[...] = jnp.dot(
        doc_ref[...],
        r_ref[...],
        precision=jax.lax.Precision.HIGHEST,      # exact f32 reduce on the MXU
        preferred_element_type=jnp.float32,
    ).astype(out_ref.dtype)


def _reduction_matrix(Q, D, G, dtype):
    """R[g*Q*D + q*D + d, g*D + d] = 1 so that  grouped_row @ R  sums over q."""
    L = Q * D
    rows = jnp.arange(G * L)
    g = rows // L
    d = rows % D
    cols = jnp.arange(G * D)
    return ((g * D + d)[:, None] == cols[None, :]).astype(dtype)


def glorep_q_attention(doc_rep, w1, b1, w2, b2, u_w, *, block_slices=2048):
    """doc_rep: (BS, S, Q, D) float32. Returns (BS, S, 1, D).

    (w1, b1, w2, b2, u_w) are accepted for interface parity with the PyTorch
    module, but because the module's softmax is over a size-1 axis the weights
    are identically 1 and these parameters cannot influence the output
    (verified against the full-formula reference in __main__).
    """
    BS, S, Q, D = doc_rep.shape
    del w1, b1, w2, b2, u_w  # mathematically dead w.r.t. the forward output

    N = BS * S
    L = Q * D

    # Group G slices per kernel row so the output last dim (G*D) is a multiple
    # of 128 lanes -> unmasked stores, no lane padding in the output tile.
    if D % 128 == 0:
        G = 1
    else:
        G = 128 // math.gcd(D, 128)
        # Keep the resident constant reduction matrix small (<= 4 MiB VMEM).
        while G > 1 and (G * L) * (G * D) * 4 > (4 << 20):
            G //= 2
    GL, GD = G * L, G * D

    # Tile selection: batch many slices per step (amortize ~0.35 us/step), keep
    # the sublane dim a multiple of 8, and keep >= 2 grid steps when there is
    # enough work (v7x has 2 TensorCores; grid axis is marked "parallel").
    Ng = _cdiv(N, G)                                   # grouped rows needed
    bg = _round_up(max(1, block_slices // G), 8)       # grouped rows per step
    tg = min(bg, max(8, _round_up(_cdiv(Ng, 2), 8)))
    ng_pad = _round_up(Ng, tg)
    n_pad = ng_pad * G

    # Lane-dense, grouped view: all reshapes below are contiguous row-major
    # no-ops in HBM; only the (optional) zero-pad moves data.
    doc2d = doc_rep.reshape(N, L)
    if n_pad != N:
        doc2d = jnp.pad(doc2d, ((0, n_pad - N), (0, 0)))
    docg = doc2d.reshape(ng_pad, GL)

    red_mat = _reduction_matrix(Q, D, G, doc_rep.dtype)

    outg = pl.pallas_call(
        glorep_reduce_kernel,
        out_shape=jax.ShapeDtypeStruct((ng_pad, GD), doc_rep.dtype),
        grid_spec=pltpu.PrefetchScalarGridSpec(
            num_scalar_prefetch=0,
            grid=(ng_pad // tg,),
            in_specs=[
                pl.BlockSpec((tg, GL), lambda i: (i, 0)),  # doc slices (lane-dense)
                pl.BlockSpec((GL, GD), lambda i: (0, 0)),  # reduction matrix (resident)
            ],
            out_specs=pl.BlockSpec((tg, GD), lambda i: (i, 0)),  # lane-dense output
        ),
        compiler_params=pltpu.CompilerParams(
            dimension_semantics=("parallel",),
        ),
    )(docg, red_mat)

    return outg.reshape(n_pad, D)[:N].reshape(BS, S, 1, D)


def reference(doc_rep, w1, b1, w2, b2, u_w):
    """Pure-JAX reference mirroring the PyTorch forward (full formula)."""
    h = jnp.tanh(doc_rep @ w1 + b1)
    u_t = h @ w2 + b2
    logits = u_t @ u_w.reshape(-1, 1)                      # (BS, S, Q, 1)
    weights = jax.nn.softmax(logits, axis=-1)              # size-1 axis -> all ones
    glo = jnp.matmul(jnp.swapaxes(weights, -1, -2), doc_rep,
                     precision=jax.lax.Precision.HIGHEST)  # (BS, S, 1, D)
    return glo


if __name__ == "__main__":
    # Small shapes consistent with the module's forward:
    # batch=2, slot axis S=4, query_length=8, word_dim=32, hidden=32
    BS, S, Q, D, H = 2, 4, 8, 32, 32

    key = jax.random.PRNGKey(0)
    k_doc, k_w1, k_b1, k_w2, k_b2, k_uw = jax.random.split(key, 6)

    doc_rep = jax.random.normal(k_doc, (BS, S, Q, D), dtype=jnp.float32)

    lim1 = 1.0 / math.sqrt(D)
    lim2 = 1.0 / math.sqrt(H)
    w1 = jax.random.uniform(k_w1, (D, H), jnp.float32, -lim1, lim1)
    b1 = jax.random.uniform(k_b1, (H,), jnp.float32, -lim1, lim1)
    w2 = jax.random.uniform(k_w2, (H, D), jnp.float32, -lim2, lim2)
    b2 = jax.random.uniform(k_b2, (D,), jnp.float32, -lim2, lim2)
    u_w = jax.random.uniform(k_uw, (D,), jnp.float32, -0.1, 0.1)

    # Small-shape check (single grid step, padded tail).
    out = glorep_q_attention(doc_rep, w1, b1, w2, b2, u_w)
    out = jax.block_until_ready(out)
    ref = reference(doc_rep, w1, b1, w2, b2, u_w)
    assert out.shape == (BS, S, 1, D)
    assert jnp.allclose(out, ref, atol=1e-4, rtol=1e-4), "mismatch vs reference (small)"

    # Larger shape: exercises multi-step grid + grouping + padded tail
    # (BS=3, S=100 like the module's "100" slot axis -> N=300 slices).
    doc_big = jax.random.normal(jax.random.PRNGKey(1), (3, 100, Q, D), jnp.float32)
    out_big = jax.block_until_ready(
        glorep_q_attention(doc_big, w1, b1, w2, b2, u_w))
    ref_big = reference(doc_big, w1, b1, w2, b2, u_w)
    assert out_big.shape == (3, 100, 1, D)
    assert jnp.allclose(out_big, ref_big, atol=1e-4, rtol=1e-4), "mismatch vs reference (big)"

    print("KERNEL_OK")
</pallas_src>

<mosaic_0001>
module attributes {stable_mosaic.version = 11 : i64} {
  func.func @glorep_reduce_kernel(%arg0: i32, %arg1: memref<8x1024xf32, #tpu.memory_space<vmem>>, %arg2: memref<1024x128xf32, #tpu.memory_space<vmem>>, %arg3: memref<8x128xf32, #tpu.memory_space<vmem>>) attributes {dimension_semantics = [#tpu.dimension_semantics<parallel>], iteration_bounds = array<i64: 1>, scalar_prefetch = 0 : i64, scratch_operands = 0 : i64, tpu.core_type = #tpu.core_type<tc>, window_params = [{transform_indices = @transform_0, window_bounds = array<i64: 8, 1024>}, {pipeline_mode = #tpu.pipeline_mode<synchronous>, transform_indices = @transform_1, window_bounds = array<i64: 1024, 128>}, {transform_indices = @transform_2, window_bounds = array<i64: 8, 128>}]} {
    %c0 = arith.constant 0 : index
    %c0_0 = arith.constant 0 : index
    %0 = vector.load %arg1[%c0, %c0_0] : memref<8x1024xf32, #tpu.memory_space<vmem>>, vector<8x1024xf32>
    %c0_1 = arith.constant 0 : index
    %c0_2 = arith.constant 0 : index
    %1 = vector.load %arg2[%c0_1, %c0_2] : memref<1024x128xf32, #tpu.memory_space<vmem>>, vector<1024x128xf32>
    %cst = arith.constant dense<0.000000e+00> : vector<8x128xf32>
    %2 = tpu.matmul %0, %1, %cst {dimension_numbers = #tpu.dot_dimension_numbers<[1], [0], [0], [1], [0, 0, 1, 1], [], []>, precision = #tpu.contract_precision<fp32>} : vector<8x1024xf32>, vector<1024x128xf32>, vector<8x128xf32> -> vector<8x128xf32>
    %c0_3 = arith.constant 0 : index
    %c0_4 = arith.constant 0 : index
    %3 = vector.load %arg3[%c0_3, %c0_4] : memref<8x128xf32, #tpu.memory_space<vmem>>, vector<8x128xf32>
    tpu.vector_store %arg3[%c0_3, %c0_4], %2 {strides = array<i32>} : memref<8x128xf32, #tpu.memory_space<vmem>>, vector<8x128xf32>,
    return
  }
  func.func @transform_0(%arg0: i32) -> (i32, i32) {
    %c0_i32 = arith.constant 0 : i32
    %c0_i32_0 = arith.constant 0 : i32
    return %arg0, %c0_i32 : i32, i32
  }
  func.func @transform_1(%arg0: i32) -> (i32, i32) {
    %c0_i32 = arith.constant 0 : i32
    %c0_i32_0 = arith.constant 0 : i32
    %c0_i32_1 = arith.constant 0 : i32
    return %c0_i32, %c0_i32_0 : i32, i32
  }
  func.func @transform_2(%arg0: i32) -> (i32, i32) {
    %c0_i32 = arith.constant 0 : i32
    %c0_i32_0 = arith.constant 0 : i32
    return %arg0, %c0_i32 : i32, i32
  }
}

</mosaic_0001>

<bundles_post_ra>
// kernel: tpu_custom_call.1
= control target key start
LH: loop header
LB: loop body
LE: loop exit
PB: predicated region body
PF: predicated region fallthrough
CT: control target
= control target key end

     0   :  { %7 = vsyncpa [#allocation3], 0  ;;  %s7211_s0 = inlined_call_operand.hbm [shape: f32[8,1024], index: 0, kind: input, shape index: {}]   ;;  %s7212_s1 = inlined_call_operand.hbm [shape: f32[1024,128], index: 1, kind: input, shape index: {}]   ;;  %s7213_s2 = inlined_call_operand.hbm [shape: f32[8,128], index: 2, kind: output, shape index: {}]  }
   0x1   :  { %8 = vsyncpa [#allocation6], 0 }
   0x2   :  { %9 = vsyncpa [#allocation4], 0  ;;  %s5324_s9 = smov [#allocation2]   ;;  %s5325_s11 = smov [#allocation5]  }
   0x3   :  { %s16_s10 = sshll.u32 %s5324_s9, 4  ;;  %s25_s12 = sshll.u32 %s5325_s11, 4  ;;  %s17_s10 = int_to_ptr.vmem [resolvable:$true] %s16_s10  ;;  %s5344_s12 = int_to_ptr.vmem [resolvable:$true] %s25_s12 }
   0x4   :  { %s5252_s15 = scalar_lea.hbm %s7211_s0, 1024 }
   0x5   :  { %p5253_p0 = scmp.ne.s32.totalorder %s7211_s0, %s5252_s15  ;;  %p5256_p1 = scmp.lt.u32.totalorder %s5252_s15, %s7211_s0 }
   0x7   :  { %p5258_p2 = pnand %p5256_p1, %p5253_p0 }
   0x9   :  { %5261 = shalt.err (!%p5258_p2)
}
   0xa   :  { %s5262_s20 = scalar_lea.vmem %s17_s10, 1024  ;;  %p5267_p4 = scmp.lt.s32.totalorder %s17_s10, %s17_s10 }
   0xb   :  { %p5263_p3 = scmp.ne.s32.totalorder %s17_s10, %s5262_s20  ;;  %p5268_p5 = scmp.lt.s32.totalorder %s5262_s20, %s5262_s20 }
   0xd   :  { %p5269_p6 = por %p5268_p5, %p5267_p4 }
   0xf   :  { %p5270_p7 = pnand %p5269_p6, %p5263_p3 }
  0x11   :  { %5273 = shalt.err (!%p5270_p7)
}
  0x12   :  { %19 = dma.hbm_to_vmem [thread:$0]  %s7211_s0, 1024, %s17_s10, [#allocation3]  }
  0x13   :  { %s5274_s25 = scalar_lea.hbm %s7212_s1, 16384 }
  0x14   :  { %p5275_p8 = scmp.ne.s32.totalorder %s7212_s1, %s5274_s25  ;;  %p5278_p9 = scmp.lt.u32.totalorder %s5274_s25, %s7212_s1 }
  0x16   :  { %p5280_p10 = pnand %p5278_p9, %p5275_p8 }
  0x18   :  { %5283 = shalt.err (!%p5280_p10)
}
  0x19   :  { %s5284_s30 = scalar_lea.vmem %s5344_s12, 16384  ;;  %p5289_p12 = scmp.lt.s32.totalorder %s5344_s12, %s5344_s12 }
  0x1a   :  { %p5285_p11 = scmp.ne.s32.totalorder %s5344_s12, %s5284_s30  ;;  %p5290_p13 = scmp.lt.s32.totalorder %s5284_s30, %s5284_s30 }
  0x1c   :  { %p5291_p0 = por %p5290_p13, %p5289_p12 }
  0x1e   :  { %p5292_p1 = pnand %p5291_p0, %p5285_p11 }
  0x20   :  { %5295 = shalt.err (!%p5292_p1)
}
  0x21   :  { %s5326_s0 = smov 128   ;;  %s5327_s3 = smov 8  }
  0x22   :  { %31 = dma.hbm_to_vmem [thread:$0]  %s7212_s1, 16384, %s5344_s12, [#allocation6], %s5326_s0, %s5326_s0, %s5327_s3  }
  0x23   :  { %5318 = dma.done.wait [#allocation3], 1024  }
  0x24   :  { %5319 = vsyncadd [#allocation3], 4294966272 }
  0x25   :  { %5320 = dma.done.wait [#allocation6], 16384  }
  0x26   :  { %5321 = vsyncadd [#allocation6], 4294950912  ;;  %v62_v0 = vld [vmem:[#allocation5 + $0x80] sm:$0xff]  ;;  %v63_v1 = vld [vmem:[#allocation5 + $0x88] sm:$0xff]  ;;  %s5328_s1 = smov [#allocation7]  }
  0x27   :  { %v46_v2 = vld [vmem:[#allocation5] sm:$0xff]  ;;  %v223_v3 = vand.u32 4294901760, %v62_v0  ;;  %v226_v4 = vand.u32 4294901760, %v63_v1  ;;  %v47_v5 = vld [vmem:[#allocation5 + $0x8] sm:$0xff]  ;;  %v64_v7 = vld [vmem:[#allocation5 + $0x90] sm:$0xff]  ;;  %s3629_s6 = sshll.u32 %s5328_s1, 4  ;;  %s3630_s6 = int_to_ptr.vmem [resolvable:$true] %s3629_s6 }
  0x28   :  { %v175_v6 = vand.u32 4294901760, %v46_v2  ;;  %v65_v8 = vld [vmem:[#allocation5 + $0x98] sm:$0xff]  ;;  %v178_v9 = vand.u32 4294901760, %v47_v5  ;;  %v229_v10 = vand.u32 4294901760, %v64_v7  ;;  %v48_v12 = vld [vmem:[#allocation5 + $0x10] sm:$0xff]  ;;  %v66_v18 = vld [vmem:[#allocation5 + $0xa0] sm:$0xff]  ;;  %p5301_p3 = scmp.lt.s32.totalorder %s3630_s6, %s3630_s6 }
  0x29   :  { %v232_v11 = vand.u32 4294901760, %v65_v8  ;;  %v49_v13 = vld [vmem:[#allocation5 + $0x18] sm:$0xff]  ;;  %v5375_v14 = vpack.c.bf16 %v226_v4, %v223_v3  ;;  %v181_v16 = vand.u32 4294901760, %v48_v12  ;;  %v67_v19 = vld [vmem:[#allocation5 + $0xa8] sm:$0xff]  ;;  %v50_v23 = vld [vmem:[#allocation5 + $0x20] sm:$0xff]  ;;  %v235_v29 = vand.u32 4294901760, %v66_v18 }
  0x2a   :  { %v5377_v15 = vsub.f32 %v46_v2, %v175_v6  ;;  %v184_v17 = vand.u32 4294901760, %v49_v13  ;;  %v5379_v20 = vpack.c.bf16 %v178_v9, %v175_v6  ;;  %v5381_v21 = vsub.f32 %v47_v5, %v178_v9  ;;  %v51_v24 = vld [vmem:[#allocation5 + $0x28] sm:$0xff]  ;;  %v68_v37 = vld [vmem:[#allocation5 + $0xb0] sm:$0xff]  ;;  %v69_v42 = vld [vmem:[#allocation5 + $0xb8] sm:$0xff]  ;;  %s5296_s7 = scalar_lea.vmem %s3630_s6, 128 }
  0x2b   :  { %v5383_v22 = vpack.c.bf16 %v232_v11, %v229_v10  ;;  %4480 = vmatprep.subr.bf16.mxu0 %v5375_v14  ;;  %v5386_v25 = vsub.f32 %v64_v7, %v229_v10  ;;  %v5388_v26 = vsub.f32 %v65_v8, %v232_v11  ;;  %v5392_v28 = vsub.f32 %v48_v12, %v181_v16  ;;  %v52_v55 = vld [vmem:[#allocation5 + $0x30] sm:$0xff]  ;;  %v53_v56 = vld [vmem:[#allocation5 + $0x38] sm:$0xff]  ;;  %v70_v5 = vld [vmem:[#allocation5 + $0xc0] sm:$0xff]  ;;  %p5297_p2 = scmp.ne.s32.totalorder %s3630_s6, %s5296_s7  ;;  %p5302_p4 = scmp.lt.s32.totalorder %s5296_s7, %s5296_s7 }
  0x2c   :  { %v5390_v27 = vpack.c.bf16 %v184_v17, %v181_v16  ;;  %4482 = vmatpush3.bf16.msra.mxu0 %v5379_v20  ;;  %v238_v30 = vand.u32 4294901760, %v67_v19  ;;  %v5395_v31 = vsub.f32 %v62_v0, %v223_v3  ;;  %v5397_v32 = vsub.f32 %v63_v1, %v226_v4  ;;  %v71_v6 = vld [vmem:[#allocation5 + $0xc8] sm:$0xff]  ;;  %v54_v11 = vld [vmem:[#allocation5 + $0x40] sm:$0xff] }
  0x2d   :  { %4484 = vmatprep.subr.bf16.mxu0 %v5383_v22  ;;  %v187_v33 = vand.u32 4294901760, %v50_v23  ;;  %v190_v34 = vand.u32 4294901760, %v51_v24  ;;  %v7229_v35 = vand.u32 4294901760, %v5377_v15  ;;  %v7228_v36 = vand.u32 4294901760, %v5381_v21  ;;  %p5303_p5 = por %p5302_p4, %p5301_p3 }
  0x2e   :  { %v5402_v38 = vsub.f32 %v49_v13, %v184_v17  ;;  %v5404_v39 = vpack.c.bf16 %v238_v30, %v235_v29  ;;  %v5406_v40 = vsub.f32 %v66_v18, %v235_v29  ;;  %v7233_v41 = vand.u32 4294901760, %v5395_v31  ;;  %v55_v29 = vld [vmem:[#allocation5 + $0x48] sm:$0xff] }
  0x2f   :  { %v5409_v43 = vsub.f32 %v67_v19, %v238_v30  ;;  %v7231_v44 = vand.u32 4294901760, %v5397_v32  ;;  %v5412_v45 = vpack.c.bf16 %v190_v34, %v187_v33  ;;  %v5414_v46 = vsub.f32 %v50_v23, %v187_v33  ;;  %p5304_p6 = pnand %p5303_p5, %p5297_p2 }
  0x30   :  { %4486 = vmatpush3.bf16.msra.mxu0 %v5390_v27  ;;  %v402_v47 = vsub.f32 %v5395_v31, %v7233_v41  ;;  %v290_v48 = vsub.f32 %v5377_v15, %v7229_v35  ;;  %v297_v49 = vsub.f32 %v5381_v21, %v7228_v36  ;;  %v241_v50 = vand.u32 4294901760, %v68_v37  ;;  %v39_v41 = vld [vmem:[#allocation2 + $0x8] sm:$0xff] }
  0x31   :  { %4488 = vmatprep.subr.bf16.mxu0 %v5404_v39  ;;  %v409_v51 = vsub.f32 %v5397_v32, %v7231_v44  ;;  %v244_v52 = vand.u32 4294901760, %v69_v42  ;;  %v7226_v53 = vand.u32 4294901760, %v5386_v25  ;;  %v7224_v54 = vand.u32 4294901760, %v5388_v26 }
  0x32   :  { %v403_v57 = vand.u32 4294901760, %v402_v47  ;;  %v5432_v58 = vsub.f32 %v51_v24, %v190_v34  ;;  %v291_v59 = vand.u32 4294901760, %v290_v48  ;;  %v298_v60 = vand.u32 4294901760, %v297_v49 }
  0x33   :  { %v410_v61 = vand.u32 4294901760, %v409_v51  ;;  %v5434_v62 = vpack.c.bf16 %v244_v52, %v241_v50  ;;  %v5436_v63 = vsub.f32 %v68_v37, %v241_v50  ;;  %v416_v0 = vsub.f32 %v5386_v25, %v7226_v53 }
  0x34   :  { %4490 = vmatpush3.bf16.msra.mxu0 %v5412_v45  ;;  %v4513_v1 = vpack.c.bf16 %v298_v60, %v291_v59  ;;  %v423_v2 = vsub.f32 %v5388_v26, %v7224_v54  ;;  %v193_v3 = vand.u32 4294901760, %v52_v55  ;;  %v196_v4 = vand.u32 4294901760, %v53_v56  ;;  %v73_v59 = vld [vmem:[#allocation5 + $0xd8] sm:$0xff] }
  0x35   :  { %v4511_v7 = vpack.c.bf16 %v410_v61, %v403_v57  ;;  %4492 = vmatprep.subr.bf16.mxu0 %v5434_v62  ;;  %v417_v8 = vand.u32 4294901760, %v416_v0  ;;  %v7223_v9 = vand.u32 4294901760, %v5392_v28  ;;  %v7221_v10 = vand.u32 4294901760, %v5402_v38  ;;  %v72_v57 = vld [vmem:[#allocation5 + $0xd0] sm:$0xff]  ;;  %v77_v54 = vld [vmem:[#allocation5 + $0xf8] sm:$0xff] }
  0x36   :  { %v5448_v12 = vsub.f32 %v69_v42, %v244_v52  ;;  %v424_v13 = vand.u32 4294901760, %v423_v2  ;;  %v5450_v16 = vpack.c.bf16 %v196_v4, %v193_v3  ;;  %v5452_v17 = vsub.f32 %v52_v55, %v193_v3 }
  0x37   :  { %4512 = vmatprep.subr.bf16.mxu1 %v4511_v7  ;;  %v304_v18 = vsub.f32 %v5392_v28, %v7223_v9  ;;  %v311_v19 = vsub.f32 %v5402_v38, %v7221_v10  ;;  %v247_v23 = vand.u32 4294901760, %v70_v5  ;;  %v250_v24 = vand.u32 4294901760, %v71_v6  ;;  %v76_v9 = vld [vmem:[#allocation5 + $0xf0] sm:$0xff] }
  0x38   :  { %4514 = vmatpush3.bf16.msra.mxu1 %v4513_v1  ;;  %v4515_v30 = vpack.c.bf16 %v424_v13, %v417_v8  ;;  %4494 = vmatpush3.bf16.msra.mxu0 %v5450_v16  ;;  %v7219_v33 = vand.u32 4294901760, %v5406_v40  ;;  %v7218_v34 = vand.u32 4294901760, %v5409_v43  ;;  %v199_v37 = vand.u32 4294901760, %v54_v11  ;;  %v56_v1 = vld [vmem:[#allocation5 + $0x50] sm:$0xff] }
  0x39   :  { %v5463_v42 = vsub.f32 %v53_v56, %v196_v4  ;;  %v305_v47 = vand.u32 4294901760, %v304_v18  ;;  %v312_v48 = vand.u32 4294901760, %v311_v19  ;;  %v5465_v49 = vpack.c.bf16 %v250_v24, %v247_v23  ;;  %v57_v18 = vld [vmem:[#allocation5 + $0x58] sm:$0xff] }
  0x3a   :  { %4516 = vmatprep.subr.bf16.mxu1 %v4515_v30  ;;  %v5467_v50 = vsub.f32 %v70_v5, %v247_v23  ;;  %v430_v51 = vsub.f32 %v5406_v40, %v7219_v33  ;;  %v437_v52 = vsub.f32 %v5409_v43, %v7218_v34  ;;  %v202_v55 = vand.u32 4294901760, %v55_v29 }
  0x3b   :  { %v4517_v56 = vpack.c.bf16 %v312_v48, %v305_v47  ;;  %4496 = vmatprep.subr.bf16.mxu0 %v5465_v49  ;;  %v5476_v60 = vsub.f32 %v71_v6, %v250_v24  ;;  %v7216_v61 = vand.u32 4294901760, %v5414_v46  ;;  %v7214_v0 = vand.u32 4294901760, %v5432_v58 }
  0x3c   :  { %v431_v2 = vand.u32 4294901760, %v430_v51  ;;  %v438_v3 = vand.u32 4294901760, %v437_v52  ;;  %v5480_v4 = vpack.c.bf16 %v202_v55, %v199_v37  ;;  %v5482_v5 = vsub.f32 %v54_v11, %v199_v37 }
  0x3d   :  { %4518 = vmatpush3.bf16.msra.mxu1 %v4517_v56  ;;  %v318_v7 = vsub.f32 %v5414_v46, %v7216_v61  ;;  %v325_v6 = vsub.f32 %v5432_v58, %v7214_v0  ;;  %v253_v8 = vand.u32 4294901760, %v72_v57  ;;  %v256_v13 = vand.u32 4294901760, %v73_v59  ;;  %v75_v0 = vld [vmem:[#allocation5 + $0xe8] sm:$0xff] }
  0x3e   :  { %v4519_v19 = vpack.c.bf16 %v438_v3, %v431_v2  ;;  %4498 = vmatpush3.bf16.msra.mxu0 %v5480_v4  ;;  %v7215_v23 = vand.u32 4294901760, %v5436_v63  ;;  %v7217_v11 = vand.u32 4294901760, %v5448_v12  ;;  %v205_v24 = vand.u32 4294901760, %v56_v1  ;;  %v74_v3 = vld [vmem:[#allocation5 + $0xe0] sm:$0xff] }
  0x3f   :  { %v5493_v30 = vsub.f32 %v55_v29, %v202_v55  ;;  %v319_v37 = vand.u32 4294901760, %v318_v7  ;;  %v326_v47 = vand.u32 4294901760, %v325_v6  ;;  %v5495_v48 = vpack.c.bf16 %v256_v13, %v253_v8  ;;  %v58_v6 = vld [vmem:[#allocation5 + $0x60] sm:$0xff] }
  0x40   :  { %4520 = vmatprep.subr.bf16.mxu1 %v4519_v19  ;;  %v5497_v51 = vsub.f32 %v72_v57, %v253_v8  ;;  %v444_v52 = vsub.f32 %v5436_v63, %v7215_v23  ;;  %v451_v56 = vsub.f32 %v5448_v12, %v7217_v11  ;;  %v208_v2 = vand.u32 4294901760, %v57_v18  ;;  %v59_v11 = vld [vmem:[#allocation5 + $0x68] sm:$0xff] }
  0x41   :  { %v4521_v29 = vpack.c.bf16 %v326_v47, %v319_v37  ;;  %4500 = vmatprep.subr.bf16.mxu0 %v5495_v48  ;;  %v5506_v55 = vsub.f32 %v73_v59, %v256_v13  ;;  %v7220_v7 = vand.u32 4294901760, %v5452_v17  ;;  %v7222_v57 = vand.u32 4294901760, %v5463_v42 }
  0x42   :  { %v445_v8 = vand.u32 4294901760, %v444_v52  ;;  %v452_v19 = vand.u32 4294901760, %v451_v56  ;;  %v5510_v23 = vpack.c.bf16 %v208_v2, %v205_v24  ;;  %v5512_v61 = vsub.f32 %v56_v1, %v205_v24 }
  0x43   :  { %4522 = vmatpush3.bf16.msra.mxu1 %v4521_v29  ;;  %v332_v37 = vsub.f32 %v5452_v17, %v7220_v7  ;;  %v339_v59 = vsub.f32 %v5463_v42, %v7222_v57  ;;  %v259_v13 = vand.u32 4294901760, %v74_v3  ;;  %v262_v47 = vand.u32 4294901760, %v75_v0 }
  0x44   :  { %7404 = vst [vmem:[#allocation11_spill] sm:$0xff] %v5510_v23  ;;  %v4523_v34 = vpack.c.bf16 %v452_v19, %v445_v8  ;;  %4502 = vmatpush3.bf16.msra.mxu0 %v5510_v23  ;;  %v7225_v52 = vand.u32 4294901760, %v5467_v50  ;;  %v7227_v1 = vand.u32 4294901760, %v5476_v60  ;;  %v211_v24 = vand.u32 4294901760, %v58_v6 }
  0x45   :  { %v5523_v56 = vsub.f32 %v57_v18, %v208_v2  ;;  %v333_v29 = vand.u32 4294901760, %v332_v37  ;;  %v340_v33 = vand.u32 4294901760, %v339_v59  ;;  %v5525_v7 = vpack.c.bf16 %v262_v47, %v259_v13  ;;  %v60_v37 = vld [vmem:[#allocation5 + $0x70] sm:$0xff] }
  0x46   :  { %4524 = vmatprep.subr.bf16.mxu1 %v4523_v34  ;;  %v5527_v10 = vsub.f32 %v74_v3, %v259_v13  ;;  %v458_v8 = vsub.f32 %v5467_v50, %v7225_v52  ;;  %v465_v19 = vsub.f32 %v5476_v60, %v7227_v1  ;;  %v214_v57 = vand.u32 4294901760, %v59_v11  ;;  %v61_v1 = vld [vmem:[#allocation5 + $0x78] sm:$0xff] }
  0x47   :  { %7405 = vst [vmem:[#allocation12_spill] sm:$0xff] %v5525_v7  ;;  %v4525_v18 = vpack.c.bf16 %v340_v33, %v333_v29  ;;  %4504 = vmatprep.subr.bf16.mxu0 %v5525_v7  ;;  %v5536_v2 = vsub.f32 %v75_v0, %v262_v47  ;;  %v7230_v34 = vand.u32 4294901760, %v5482_v5  ;;  %v7232_v3 = vand.u32 4294901760, %v5493_v30 }
  0x48   :  { %v459_v59 = vand.u32 4294901760, %v458_v8  ;;  %v466_v13 = vand.u32 4294901760, %v465_v19  ;;  %v5540_v52 = vpack.c.bf16 %v214_v57, %v211_v24  ;;  %v5542_v53 = vsub.f32 %v58_v6, %v211_v24 }
  0x49   :  { %4526 = vmatpush3.bf16.msra.mxu1 %v4525_v18  ;;  %v346_v33 = vsub.f32 %v5482_v5, %v7230_v34  ;;  %v353_v0 = vsub.f32 %v5493_v30, %v7232_v3  ;;  %v265_v47 = vand.u32 4294901760, %v76_v9  ;;  %v268_v29 = vand.u32 4294901760, %v77_v54 }
  0x4a   :  { %7406 = vst [vmem:[#allocation13_spill] sm:$0xff] %v5540_v52  ;;  %v4527_v36 = vpack.c.bf16 %v466_v13, %v459_v59  ;;  %4506 = vmatpush3.bf16.msra.mxu0 %v5540_v52  ;;  %v7236_v8 = vand.u32 4294901760, %v5497_v51  ;;  %v7237_v6 = vand.u32 4294901760, %v5506_v55  ;;  %v217_v24 = vand.u32 4294901760, %v60_v37 }
  0x4b   :  { %v5553_v19 = vsub.f32 %v59_v11, %v214_v57  ;;  %v347_v18 = vand.u32 4294901760, %v346_v33  ;;  %v354_v35 = vand.u32 4294901760, %v353_v0  ;;  %v5555_v34 = vpack.c.bf16 %v268_v29, %v265_v47 }
  0x4c   :  { %4528 = vmatprep.subr.bf16.mxu1 %v4527_v36  ;;  %v5557_v44 = vsub.f32 %v76_v9, %v265_v47  ;;  %v472_v59 = vsub.f32 %v5497_v51, %v7236_v8  ;;  %v479_v13 = vsub.f32 %v5506_v55, %v7237_v6  ;;  %v220_v3 = vand.u32 4294901760, %v61_v1  ;;  %v38_v9 = vld [vmem:[#allocation2] sm:$0xff] }
  0x4d   :  { %7407 = vst [vmem:[#allocation14_spill] sm:$0xff] %v5555_v34  ;;  %v4529_v52 = vpack.c.bf16 %v354_v35, %v347_v18  ;;  %4508 = vmatprep.subr.bf16.mxu0 %v5555_v34  ;;  %v5566_v11 = vsub.f32 %v77_v54, %v268_v29  ;;  %v7238_v57 = vand.u32 4294901760, %v5512_v61  ;;  %v7239_v36 = vand.u32 4294901760, %v5523_v56 }
  0x4e   :  { %v473_v33 = vand.u32 4294901760, %v472_v59  ;;  %v480_v0 = vand.u32 4294901760, %v479_v13  ;;  %v5570_v47 = vpack.c.bf16 %v220_v3, %v217_v24  ;;  %v5572_v8 = vsub.f32 %v60_v37, %v217_v24 }
  0x4f   :  { %4530 = vmatpush3.bf16.msra.mxu1 %v4529_v52  ;;  %v360_v35 = vsub.f32 %v5512_v61, %v7238_v57  ;;  %v367_v54 = vsub.f32 %v5523_v56, %v7239_v36  ;;  %v5580_v29 = vand.u32 4294901760, %v39_v41  ;;  %v7242_v18 = vand.u32 4294901760, %v5527_v10 }
  0x50   :  { %7408 = vst [vmem:[#allocation15_spill] sm:$0xff] %v5570_v47  ;;  %v4531_v6 = vpack.c.bf16 %v480_v0, %v473_v33  ;;  %4510 = vmatpush3.bf16.msra.mxu0 %v5570_v47  ;;  %v7248_v59 = vand.u32 4294901760, %v5536_v2  ;;  %v4543_v52 = vpack.c.bf16 %v5397_v32, %v5395_v31  ;;  %v5587_v37 = vand.u32 4294901760, %v38_v9 }
  0x51   :  { %7409 = vst [vmem:[#allocation16_spill] sm:$0xff] %v5580_v29  ;;  %v361_v24 = vand.u32 4294901760, %v360_v35  ;;  %v368_v13 = vand.u32 4294901760, %v367_v54  ;;  %v5590_v57 = vsub.f32 %v39_v41, %v5580_v29  ;;  %v486_v36 = vsub.f32 %v5527_v10, %v7242_v18  ;;  %511 = vmatprep.mubr.f32.mxu1 %v5580_v29 }
  0x52   :  { %4532 = vmatprep.subr.bf16.mxu1 %v4531_v6  ;;  %v493_v33 = vsub.f32 %v5536_v2, %v7248_v59  ;;  %4544 = vmatprep.subr.bf16.mxu0 %v4543_v52  ;;  %v5600_v0 = vsub.f32 %v38_v9, %v5587_v37  ;;  %v7247_v35 = vand.u32 4294901760, %v5542_v53  ;;  %v7249_v41 = vand.u32 4294901760, %v5553_v19 }
  0x53   :  { %v5604_v54 = vsub.f32 %v61_v1, %v220_v3  ;;  %v4533_v47 = vpack.c.bf16 %v368_v13, %v361_v24  ;;  %v7250_v18 = vand.u32 4294901760, %v5590_v57  ;;  %v487_v34 = vand.u32 4294901760, %v486_v36 }
  0x54   :  { %v494_v29 = vand.u32 4294901760, %v493_v33  ;;  %v278_v6 = vand.u32 4294901760, %v5600_v0  ;;  %v374_v52 = vsub.f32 %v5542_v53, %v7247_v35  ;;  %v381_v9 = vsub.f32 %v5553_v19, %v7249_v41 }
  0x55   :  { %4534 = vmatpush3.bf16.msra.mxu1 %v4533_v47  ;;  %v273_v1 = vsub.f32 %v5590_v57, %v7250_v18  ;;  %v4545_v3 = vpack.c.bf16 %v5381_v21, %v5377_v15  ;;  %v7255_v36 = vand.u32 4294901760, %v5557_v44  ;;  %v7258_v24 = vand.u32 4294901760, %v5566_v11 }
  0x56   :  { %v4535_v13 = vpack.c.bf16 %v494_v29, %v487_v34  ;;  %v279_v33 = vsub.f32 %v5600_v0, %v278_v6  ;;  %v375_v35 = vand.u32 4294901760, %v374_v52  ;;  %v382_v59 = vand.u32 4294901760, %v381_v9 }
  0x57   :  { %v274_v41 = vand.u32 4294901760, %v273_v1  ;;  %v500_v47 = vsub.f32 %v5557_v44, %v7255_v36  ;;  %v507_v18 = vsub.f32 %v5566_v11, %v7258_v24  ;;  %v7257_v7 = vand.u32 4294901760, %v5572_v8 }
  0x58   :  { %4536 = vmatprep.subr.bf16.mxu1 %v4535_v13  ;;  %v280_v23 = vand.u32 4294901760, %v279_v33  ;;  %v4537_v34 = vpack.c.bf16 %v382_v59, %v375_v35  ;;  %v4547_v29 = vpack.c.bf16 %v5388_v26, %v5386_v25  ;;  %v7256_v52 = vand.u32 4294901760, %v5604_v54 }
  0x59   :  { %275 = vmatprep.mubr.f32.mxu0 %v274_v41  ;;  %v501_v9 = vand.u32 4294901760, %v500_v47  ;;  %v508_v1 = vand.u32 4294901760, %v507_v18  ;;  %v388_v36 = vsub.f32 %v5572_v8, %v7257_v7  ;;  %v4549_v33 = vpack.c.bf16 %v5402_v38, %v5392_v28 }
  0x5a   :  { %281 = vmatmul.mubr.f32.vlgmr.msra.gmra.mrb[0].mxu0 %v280_v23  ;;  %4538 = vmatpush3.bf16.msra.mxu1 %v4537_v34  ;;  %v395_v13 = vsub.f32 %v5604_v54, %v7256_v52  ;;  %v4551_v41 = vpack.c.bf16 %v5409_v43, %v5406_v40  ;;  %v4553_v23 = vpack.c.bf16 %v5432_v58, %v5414_v46  ;;  %v7411_v34 = vand.u32 4294901760, %v5397_v32 }
  0x5b   :  { %4546 = vmatpush3.bf16.msra.mxu0 %v4545_v3  ;;  %v4539_v59 = vpack.c.bf16 %v508_v1, %v501_v9  ;;  %v389_v35 = vand.u32 4294901760, %v388_v36  ;;  %648 = vmatprep.mubr.f32.mxu0 %v5590_v57  ;;  %v4555_v47 = vpack.c.bf16 %v5448_v12, %v5436_v63  ;;  %v7410_v36 = vand.u32 4294901760, %v5395_v31 }
  0x5c   :  { %4548 = vmatprep.subr.bf16.mxu0 %v4547_v29  ;;  %v396_v18 = vand.u32 4294901760, %v395_v13  ;;  %v7412_v1 = vand.u32 4294901760, %v5377_v15  ;;  %v7413_v29 = vand.u32 4294901760, %v5381_v21  ;;  %v7414_v52 = vand.u32 4294901760, %v5386_v25 }
  0x5d   :  { %4540 = vmatprep.subr.bf16.mxu1 %v4539_v59  ;;  %v4607_v9 = vpack.c.bf16 %v7411_v34, %v7410_v36  ;;  %v7415_v59 = vand.u32 4294901760, %v5388_v26  ;;  %v7416_v24 = vand.u32 4294901760, %v5392_v28  ;;  %v7418_v31 = vand.u32 4294901760, %v5406_v40 }
  0x5e   :  { %v4541_v3 = vpack.c.bf16 %v396_v18, %v389_v35  ;;  %v4609_v13 = vpack.c.bf16 %v7413_v29, %v7412_v1  ;;  %v7417_v35 = vand.u32 4294901760, %v5402_v38  ;;  %v7419_v32 = vand.u32 4294901760, %v5409_v43  ;;  %v7433_v29 = vld [vmem:[#allocation16_spill] sm:$0xff] }
  0x5f   :  { %v4611_v7 = vpack.c.bf16 %v7415_v59, %v7414_v52  ;;  %4550 = vmatpush3.bf16.msra.mxu0 %v4549_v33  ;;  %v7420_v15 = vand.u32 4294901760, %v5414_v46  ;;  %v7421_v21 = vand.u32 4294901760, %v5432_v58  ;;  %v7422_v25 = vand.u32 4294901760, %v5436_v63  ;;  %v95_v59 = vld [vmem:[#allocation5 + $0x188] sm:$0xff] }
  0x60   :  { %v4613_v18 = vpack.c.bf16 %v7417_v35, %v7416_v24  ;;  %v4615_v36 = vpack.c.bf16 %v7419_v32, %v7418_v31  ;;  %v7423_v26 = vand.u32 4294901760, %v5448_v12  ;;  %4542 = vmatpush3.bf16.msra.mxu1 %v4541_v3  ;;  %4552 = vmatprep.subr.bf16.mxu0 %v4551_v41  ;;  %v7424_v28 = vand.u32 4294901760, %v5452_v17  ;;  %v78_v35 = vld [vmem:[#allocation5 + $0x100] sm:$0xff]  ;;  %v79_v31 = vld [vmem:[#allocation5 + $0x108] sm:$0xff]  ;;  %v7434_v32 = vld [vmem:[#allocation13_spill] sm:$0xff] }
  0x61   :  { %v5673_v34 = vpack.c.bf16 %v7421_v21, %v7420_v15  ;;  %v7425_v38 = vand.u32 4294901760, %v5463_v42  ;;  %v7426_v43 = vand.u32 4294901760, %v5467_v50  ;;  %v7427_v46 = vand.u32 4294901760, %v5476_v60  ;;  %4576 = vmatprep.subr.bf16.mxu1 %v5375_v14  ;;  %v7435_v15 = vld [vmem:[#allocation14_spill] sm:$0xff] }
  0x62   :  { %v5679_v52 = vpack.c.bf16 %v7423_v26, %v7422_v25  ;;  %v7428_v63 = vand.u32 4294901760, %v5482_v5  ;;  %v7429_v12 = vand.u32 4294901760, %v5493_v30  ;;  %v4557_v33 = vpack.c.bf16 %v5463_v42, %v5452_v17 }
  0x63   :  { %v5685_v40 = vpack.c.bf16 %v7425_v38, %v7424_v28  ;;  %v5691_v58 = vpack.c.bf16 %v7427_v46, %v7426_v43  ;;  %513 = vmatmul.mubr.f32.vlgmr.msra.gmra.mrb[0].mxu1 %v5587_v37  ;;  %4554 = vmatpush3.bf16.msra.mxu0 %v4553_v23  ;;  %v4559_v41 = vpack.c.bf16 %v5476_v60, %v5467_v50  ;;  %v7430_v3 = vand.u32 4294901760, %v5590_v57  ;;  %v7431_v57 = vld [vmem:[#allocation11_spill] sm:$0xff]  ;;  %v7432_v23 = vld [vmem:[#allocation12_spill] sm:$0xff] }
  0x64   :  { %v5697_v24 = vpack.c.bf16 %v7429_v12, %v7428_v63  ;;  %4578 = vmatpush3.bf16.msra.mxu1 %v5379_v20  ;;  %4556 = vmatprep.subr.bf16.mxu0 %v4555_v47  ;;  %v4561_v1 = vpack.c.bf16 %v5493_v30, %v5482_v5  ;;  %v4563_v17 = vpack.c.bf16 %v5506_v55, %v5497_v51  ;;  %v94_v47 = vld [vmem:[#allocation5 + $0x180] sm:$0xff]  ;;  %v1088_v25 = vand.u32 4294901760, %v95_v59  ;;  %v7436_v28 = vld [vmem:[#allocation15_spill] sm:$0xff]  ;;  %v96_v38 = vld [vmem:[#allocation5 + $0x190] sm:$0xff] }
  0x65   :  { %4580 = vmatprep.subr.bf16.mxu1 %v5383_v22  ;;  %755 = vmatprep.mubr.f32.mxu1 %v7430_v3  ;;  %v4565_v42 = vpack.c.bf16 %v5523_v56, %v5512_v61  ;;  %v4567_v50 = vpack.c.bf16 %v5536_v2, %v5527_v10  ;;  %v4569_v60 = vpack.c.bf16 %v5553_v19, %v5542_v53  ;;  %v1085_v21 = vand.u32 4294901760, %v94_v47  ;;  %v80_v46 = vld [vmem:[#allocation5 + $0x110] sm:$0xff]  ;;  %v81_v63 = vld [vmem:[#allocation5 + $0x118] sm:$0xff] }
  0x66   :  { %v4571_v5 = vpack.c.bf16 %v5566_v11, %v5557_v44  ;;  %v4573_v30 = vpack.c.bf16 %v5604_v54, %v5572_v8  ;;  %v1037_v26 = vand.u32 4294901760, %v78_v35  ;;  %v5741_v12 = vsub.f32 %v95_v59, %v1088_v25 }
  0x67   :  { %4558 = vmatpush3.bf16.msra.mxu0 %v4557_v33  ;;  %v5739_v43 = vsub.f32 %v94_v47, %v1085_v21 }
  0x68   :  { %4582 = vmatpush3.bf16.msra.mxu1 %v5390_v27  ;;  %4560 = vmatprep.subr.bf16.mxu0 %v4559_v41  ;;  %v1091_v41 = vand.u32 4294901760, %v96_v38  ;;  %v7268_v59 = vand.u32 4294901760, %v5741_v12 }
  0x69   :  { %4584 = vmatprep.subr.bf16.mxu1 %v5404_v39 }
  0x6b   :  { %4562 = vmatpush3.bf16.msra.mxu0 %v4561_v1  ;;  %v7439_v1 = vand.u32 4294901760, %v5512_v61 }
  0x6c   :  { %4586 = vmatpush3.bf16.msra.mxu1 %v5412_v45  ;;  %4564 = vmatprep.subr.bf16.mxu0 %v4563_v17  ;;  %v7440_v17 = vand.u32 4294901760, %v5523_v56  ;;  %v7445_v56 = vand.u32 4294901760, %v5557_v44  ;;  %v82_v44 = vld [vmem:[#allocation5 + $0x120] sm:$0xff] }
  0x6d   :  { %4588 = vmatprep.subr.bf16.mxu1 %v5434_v62 }
  0x6f   :  { %4566 = vmatpush3.bf16.msra.mxu0 %v4565_v42  ;;  %v4629_v42 = vpack.c.bf16 %v7440_v17, %v7439_v1  ;;  %v100_v17 = vld [vmem:[#allocation5 + $0x1b0] sm:$0xff] }
  0x70   :  { %4590 = vmatpush3.bf16.msra.mxu1 %v5450_v16  ;;  %4568 = vmatprep.subr.bf16.mxu0 %v4567_v50  ;;  %v98_v50 = vld [vmem:[#allocation5 + $0x1a0] sm:$0xff] }
  0x71   :  { %4592 = vmatprep.subr.bf16.mxu1 %v5465_v49 }
  0x73   :  { %4570 = vmatpush3.bf16.msra.mxu0 %v4569_v60  ;;  %v99_v60 = vld [vmem:[#allocation5 + $0x1a8] sm:$0xff] }
  0x74   :  { %4594 = vmatpush3.bf16.msra.mxu1 %v5480_v4  ;;  %4572 = vmatprep.subr.bf16.mxu0 %v4571_v5 }
  0x75   :  { %4596 = vmatprep.subr.bf16.mxu1 %v5495_v48 }
  0x77   :  { %4574 = vmatpush3.bf16.msra.mxu0 %v4573_v30  ;;  %v7448_v30 = vand.u32 4294901760, %v5604_v54 }
  0x78   :  { %4598 = vmatpush3.bf16.msra.mxu1 %v7431_v57  ;;  %4608 = vmatprep.subr.bf16.mxu0 %v4607_v9  ;;  %v1040_v9 = vand.u32 4294901760, %v79_v31 }
  0x79   :  { %4600 = vmatprep.subr.bf16.mxu1 %v7432_v23 }
  0x7a   :  { %651 = vmatmul.mubr.f32.vlgmr.msra.gmra.mrb[2].mxu0 %v5600_v0  ;;  %v5745_v33 = vsub.f32 %v79_v31, %v1040_v9  ;;  %v7441_v0 = vand.u32 4294901760, %v5527_v10  ;;  %v7446_v10 = vand.u32 4294901760, %v5566_v11 }
  0x7b   :  { %4610 = vmatpush3.bf16.msra.mxu0 %v4609_v13  ;;  %925 = vmatprep.mubr.f32.mxu0 %v7433_v29  ;;  %v97_v13 = vld [vmem:[#allocation5 + $0x198] sm:$0xff] }
  0x7c   :  { %4602 = vmatpush3.bf16.msra.mxu1 %v7434_v32  ;;  %4612 = vmatprep.subr.bf16.mxu0 %v4611_v7  ;;  %v5743_v7 = vsub.f32 %v78_v35, %v1037_v26  ;;  %v1094_v3 = vand.u32 4294901760, %v97_v13  ;;  %v5777_v5 = vpack.c.bf16 %v7446_v10, %v7445_v56  ;;  %v83_v35 = vld [vmem:[#allocation5 + $0x128] sm:$0xff]  ;;  %v7259_v31 = vand.u32 4294901760, %v5745_v33 }
  0x7d   :  { %4604 = vmatprep.subr.bf16.mxu1 %v7435_v15 }
  0x7e   :  { %v7265_v11 = vand.u32 4294901760, %v5743_v7  ;;  %v5795_v54 = vpack.c.bf16 %v1094_v3, %v1091_v41 }
  0x7f   :  { %4614 = vmatpush3.bf16.msra.mxu0 %v4613_v18  ;;  %v7437_v18 = vand.u32 4294901760, %v5497_v51  ;;  %v1043_v51 = vand.u32 4294901760, %v80_v46 }
  0x80   :  { %4606 = vmatpush3.bf16.msra.mxu1 %v7436_v28  ;;  %4616 = vmatprep.subr.bf16.mxu0 %v4615_v36  ;;  %v7438_v36 = vand.u32 4294901760, %v5506_v55  ;;  %v1046_v55 = vand.u32 4294901760, %v81_v63  ;;  %7450 = vst [vmem:[#allocation12_spill] sm:$0xff] %v5795_v54 }
  0x81   :  { %4640 = vmatprep.subr.bf16.mxu1 %v5375_v14 }
  0x82   :  { %v4627_v14 = vpack.c.bf16 %v7438_v36, %v7437_v18  ;;  %v1100_v18 = vand.u32 4294901760, %v99_v60  ;;  %v5803_v36 = vpack.c.bf16 %v1046_v55, %v1043_v51 }
  0x83   :  { %759 = vmatmul.mubr.f32.vlgmr.msra.gmra.mrb[2].mxu1 %v278_v6  ;;  %4618 = vmatpush3.bf16.msra.mxu0 %v5673_v34  ;;  %v7442_v6 = vand.u32 4294901760, %v5536_v2  ;;  %v7447_v2 = vand.u32 4294901760, %v5572_v8  ;;  %v5793_v8 = vpack.c.bf16 %v1040_v9, %v1037_v26  ;;  %v1049_v9 = vand.u32 4294901760, %v82_v44 }
  0x84   :  { %4642 = vmatpush3.bf16.msra.mxu1 %v5379_v20  ;;  %4620 = vmatprep.subr.bf16.mxu0 %v5679_v52  ;;  %v7443_v20 = vand.u32 4294901760, %v5542_v53  ;;  %v7444_v52 = vand.u32 4294901760, %v5553_v19  ;;  %v41_v53 = vld [vmem:[#allocation2 + $0x18] sm:$0xff]  ;;  %v5787_v19 = vpack.c.bf16 %v1088_v25, %v1085_v21  ;;  %v5799_v21 = vsub.f32 %v96_v38, %v1091_v41  ;;  %7451 = vst [vmem:[#allocation16_spill] sm:$0xff] %v5803_v36 }
  0x85   :  { %v5764_v34 = vpack.c.bf16 %v7442_v6, %v7441_v0  ;;  %4644 = vmatprep.subr.bf16.mxu1 %v5383_v22  ;;  %v5783_v47 = vpack.c.bf16 %v7448_v30, %v7447_v2  ;;  %1029 = vmatprep.mubr.f32.mxu1 %v7433_v29  ;;  %v7269_v22 = vand.u32 4294901760, %v5739_v43  ;;  %7449 = vst [vmem:[#allocation11_spill] sm:$0xff] %v5793_v8  ;;  %v1097_v29 = vand.u32 4294901760, %v98_v50 }
  0x86   :  { %v5771_v61 = vpack.c.bf16 %v7444_v52, %v7443_v20  ;;  %v5801_v25 = vsub.f32 %v97_v13, %v1094_v3  ;;  %v5805_v1 = vand.u32 4294901760, %v41_v53  ;;  %v5813_v38 = vsub.f32 %v81_v63, %v1046_v55  ;;  %v84_v52 = vld [vmem:[#allocation5 + $0x130] sm:$0xff] }
  0x87   :  { %4622 = vmatpush3.bf16.msra.mxu0 %v5685_v40  ;;  %v5808_v40 = vsub.f32 %v80_v46, %v1043_v51  ;;  %v1264_v26 = vsub.f32 %v5739_v43, %v7269_v22  ;;  %v1271_v13 = vsub.f32 %v5741_v12, %v7268_v59  ;;  %v1159_v46 = vsub.f32 %v5745_v33, %v7259_v31  ;;  %v102_v31 = vld [vmem:[#allocation5 + $0x1c0] sm:$0xff]  ;;  %v89_v22 = vld [vmem:[#allocation5 + $0x158] sm:$0xff] }
  0x88   :  { %4646 = vmatpush3.bf16.msra.mxu1 %v5390_v27  ;;  %4624 = vmatprep.subr.bf16.mxu0 %v5691_v58  ;;  %7452 = vst [vmem:[#allocation13_spill] sm:$0xff] %v5805_v1  ;;  %v1052_v27 = vand.u32 4294901760, %v83_v35  ;;  %v101_v58 = vld [vmem:[#allocation5 + $0x1b8] sm:$0xff]  ;;  %v5825_v41 = vpack.c.bf16 %v1100_v18, %v1097_v29  ;;  %v5827_v3 = vsub.f32 %v98_v50, %v1097_v29  ;;  %v1103_v6 = vand.u32 4294901760, %v100_v17 }
  0x89   :  { %4648 = vmatprep.subr.bf16.mxu1 %v5404_v39  ;;  %v1152_v39 = vsub.f32 %v5743_v7, %v7265_v11  ;;  %v5829_v63 = vsub.f32 %v99_v60, %v1100_v18  ;;  %v5832_v0 = vsub.f32 %v41_v53, %v5805_v1  ;;  %v1106_v51 = vand.u32 4294901760, %v101_v58 }
  0x8a   :  { %7453 = vst [vmem:[#allocation14_spill] sm:$0xff] %v5825_v41  ;;  %v7263_v55 = vand.u32 4294901760, %v5799_v21  ;;  %v7260_v20 = vand.u32 4294901760, %v5801_v25  ;;  %v1265_v50 = vand.u32 4294901760, %v1264_v26  ;;  %v5838_v56 = vpack.c.bf16 %v1052_v27, %v1049_v9 }
  0x8b   :  { %4626 = vmatpush3.bf16.msra.mxu0 %v5697_v24  ;;  %v85_v24 = vld [vmem:[#allocation5 + $0x138] sm:$0xff]  ;;  %v5840_v60 = vsub.f32 %v82_v44, %v1049_v9  ;;  %v5842_v10 = vsub.f32 %v83_v35, %v1052_v27  ;;  %v1272_v2 = vand.u32 4294901760, %v1271_v13  ;;  %v7262_v30 = vand.u32 4294901760, %v5808_v40  ;;  %v103_v27 = vld [vmem:[#allocation5 + $0x1c8] sm:$0xff] }
  0x8c   :  { %4650 = vmatpush3.bf16.msra.mxu1 %v5412_v45  ;;  %4628 = vmatprep.subr.bf16.mxu0 %v4627_v14  ;;  %7454 = vst [vmem:[#allocation15_spill] sm:$0xff] %v5838_v56  ;;  %v1153_v45 = vand.u32 4294901760, %v1152_v39  ;;  %v1160_v14 = vand.u32 4294901760, %v1159_v46  ;;  %v1055_v53 = vand.u32 4294901760, %v84_v52  ;;  %v1058_v29 = vand.u32 4294901760, %v85_v24 }
  0x8d   :  { %4652 = vmatprep.subr.bf16.mxu1 %v5434_v62  ;;  %v7261_v18 = vand.u32 4294901760, %v5813_v38  ;;  %v7272_v62 = vand.u32 4294901760, %v5832_v0  ;;  %v5849_v44 = vpack.c.bf16 %v1106_v51, %v1103_v6  ;;  %v1278_v35 = vsub.f32 %v5799_v21, %v7263_v55 }
  0x8e   :  { %v5858_v26 = vsub.f32 %v100_v17, %v1103_v6  ;;  %v5860_v9 = vsub.f32 %v101_v58, %v1106_v51  ;;  %v5864_v13 = vpack.c.bf16 %v1272_v2, %v1265_v50  ;;  %v5866_v39 = vpack.c.bf16 %v1160_v14, %v1153_v45 }
  0x8f   :  { %4630 = vmatpush3.bf16.msra.mxu0 %v4629_v42  ;;  %7455 = vst [vmem:[#allocation17_spill] sm:$0xff] %v5849_v44  ;;  %v1285_v42 = vsub.f32 %v5801_v25, %v7260_v20  ;;  %v1166_v46 = vsub.f32 %v5808_v40, %v7262_v30  ;;  %v1109_v20 = vand.u32 4294901760, %v102_v31  ;;  %v1173_v17 = vsub.f32 %v5813_v38, %v7261_v18 }
  0x90   :  { %4654 = vmatpush3.bf16.msra.mxu1 %v5450_v16  ;;  %4632 = vmatprep.subr.bf16.mxu0 %v5764_v34  ;;  %v7264_v16 = vand.u32 4294901760, %v5827_v3  ;;  %v7267_v34 = vand.u32 4294901760, %v5829_v63  ;;  %v7266_v58 = vand.u32 4294901760, %v5840_v60  ;;  %v1135_v6 = vsub.f32 %v5832_v0, %v7272_v62 }
  0x91   :  { %4656 = vmatprep.subr.bf16.mxu1 %v5465_v49  ;;  %v5872_v49 = vpack.c.bf16 %v1058_v29, %v1055_v53  ;;  %v1279_v51 = vand.u32 4294901760, %v1278_v35  ;;  %v1286_v50 = vand.u32 4294901760, %v1285_v42  ;;  %v1112_v2 = vand.u32 4294901760, %v103_v27  ;;  %v87_v42 = vld [vmem:[#allocation5 + $0x148] sm:$0xff] }
  0x92   :  { %v7271_v45 = vand.u32 4294901760, %v5842_v10  ;;  %v5885_v14 = vsub.f32 %v84_v52, %v1055_v53  ;;  %v5887_v18 = vsub.f32 %v85_v24, %v1058_v29  ;;  %v1292_v30 = vsub.f32 %v5827_v3, %v7264_v16  ;;  %v104_v29 = vld [vmem:[#allocation5 + $0x1d0] sm:$0xff]  ;;  %v105_v16 = vld [vmem:[#allocation5 + $0x1d8] sm:$0xff] }
  0x93   :  { %4634 = vmatpush3.bf16.msra.mxu0 %v5771_v61  ;;  %7456 = vst [vmem:[#allocation18_spill] sm:$0xff] %v5872_v49  ;;  %v86_v61 = vld [vmem:[#allocation5 + $0x140] sm:$0xff]  ;;  %v5895_v35 = vsub.f32 %v102_v31, %v1109_v20  ;;  %v7270_v55 = vand.u32 4294901760, %v5858_v26  ;;  %v1174_v52 = vand.u32 4294901760, %v1173_v17  ;;  %v1180_v53 = vsub.f32 %v5840_v60, %v7266_v58 }
  0x94   :  { %4658 = vmatpush3.bf16.msra.mxu1 %v5480_v4  ;;  %4636 = vmatprep.subr.bf16.mxu0 %v5777_v5  ;;  %v1299_v4 = vsub.f32 %v5829_v63, %v7267_v34  ;;  %v1167_v5 = vand.u32 4294901760, %v1166_v46  ;;  %v1061_v24 = vand.u32 4294901760, %v86_v61  ;;  %v1136_v11 = vand.u32 4294901760, %v1135_v6  ;;  %v88_v6 = vld [vmem:[#allocation5 + $0x150] sm:$0xff] }
  0x95   :  { %4660 = vmatprep.subr.bf16.mxu1 %v5495_v48  ;;  %v7273_v48 = vand.u32 4294901760, %v5860_v9  ;;  %v5905_v31 = vpack.c.bf16 %v1286_v50, %v1279_v51  ;;  %v5907_v46 = vpack.c.bf16 %v1112_v2, %v1109_v20  ;;  %v5913_v17 = vsub.f32 %v103_v27, %v1112_v2 }
  0x96   :  { %v1293_v58 = vand.u32 4294901760, %v1292_v30  ;;  %v1300_v34 = vand.u32 4294901760, %v1299_v4  ;;  %v1064_v59 = vand.u32 4294901760, %v87_v42  ;;  %v1118_v51 = vand.u32 4294901760, %v105_v16 }
  0x97   :  { %4638 = vmatpush3.bf16.msra.mxu0 %v5783_v47  ;;  %7457 = vst [vmem:[#allocation19_spill] sm:$0xff] %v5907_v46  ;;  %v1187_v47 = vsub.f32 %v5842_v10, %v7271_v45  ;;  %v1306_v20 = vsub.f32 %v5858_v26, %v7270_v55  ;;  %v1313_v50 = vsub.f32 %v5860_v9, %v7273_v48  ;;  %v1181_v27 = vand.u32 4294901760, %v1180_v53  ;;  %v106_v48 = vld [vmem:[#allocation5 + $0x1e0] sm:$0xff]  ;;  %v107_v53 = vld [vmem:[#allocation5 + $0x1e8] sm:$0xff] }
  0x98   :  { %4662 = vmatpush3.bf16.msra.mxu1 %v7431_v57  ;;  %4672 = vmatprep.subr.bf16.mxu0 %v5787_v19  ;;  %v1115_v57 = vand.u32 4294901760, %v104_v29  ;;  %v5925_v30 = vsub.f32 %v86_v61, %v1061_v24  ;;  %v1067_v55 = vand.u32 4294901760, %v88_v6  ;;  %v1070_v45 = vand.u32 4294901760, %v89_v22 }
  0x99   :  { %4664 = vmatprep.subr.bf16.mxu1 %v7432_v23  ;;  %v5923_v23 = vpack.c.bf16 %v1174_v52, %v1167_v5  ;;  %v1188_v4 = vand.u32 4294901760, %v1187_v47  ;;  %v7278_v62 = vand.u32 4294901760, %v5887_v18  ;;  %v5932_v5 = vpack.c.bf16 %v1300_v34, %v1293_v58 }
  0x9a   :  { %927 = vmatmul.mubr.f32.vlgmr.msra.gmra.mrb[4].mxu0 %v5587_v37  ;;  %v5934_v61 = vpack.c.bf16 %v1064_v59, %v1061_v24  ;;  %v5936_v52 = vsub.f32 %v87_v42, %v1064_v59  ;;  %v1307_v2 = vand.u32 4294901760, %v1306_v20  ;;  %v1314_v47 = vand.u32 4294901760, %v1313_v50  ;;  %v5969_v50 = vld [vmem:[#allocation5 + $0x168] sm:$0xff] }
  0x9b   :  { %4674 = vmatpush3.bf16.msra.mxu0 %v5793_v8  ;;  %1137 = vmatprep.mubr.f32.mxu0 %v1136_v11  ;;  %v7280_v11 = vand.u32 4294901760, %v5895_v35  ;;  %v5942_v8 = vld [vmem:[#allocation5 + $0x160] sm:$0xff]  ;;  %v5947_v34 = vsub.f32 %v105_v16, %v1118_v51  ;;  %v7461_v59 = vand.u32 4294901760, %v5885_v14  ;;  %v1121_v42 = vand.u32 4294901760, %v106_v48 }
  0x9c   :  { %4666 = vmatpush3.bf16.msra.mxu1 %v7434_v32  ;;  %4676 = vmatprep.subr.bf16.mxu0 %v5795_v54  ;;  %v5939_v32 = vpack.c.bf16 %v1118_v51, %v1115_v57  ;;  %v7279_v54 = vand.u32 4294901760, %v5913_v17  ;;  %v5954_v24 = vpack.c.bf16 %v1188_v4, %v1181_v27  ;;  %v5956_v20 = vpack.c.bf16 %v1070_v45, %v1067_v55 }
  0x9d   :  { %4668 = vmatprep.subr.bf16.mxu1 %v7435_v15  ;;  %v5945_v15 = vsub.f32 %v104_v29, %v1115_v57  ;;  %7460 = vst [vmem:[#allocation22_spill] sm:$0xff] %v5947_v34  ;;  %v1194_v58 = vsub.f32 %v5885_v14, %v7461_v59  ;;  %v1201_v29 = vsub.f32 %v5887_v18, %v7278_v62  ;;  %v1124_v57 = vand.u32 4294901760, %v107_v53 }
  0x9e   :  { %7458 = vst [vmem:[#allocation20_spill] sm:$0xff] %v5939_v32  ;;  %v5962_v16 = vsub.f32 %v88_v6, %v1067_v55  ;;  %v5964_v51 = vsub.f32 %v89_v22, %v1070_v45  ;;  %v7281_v27 = vand.u32 4294901760, %v5942_v8  ;;  %v4715_v4 = vpack.c.bf16 %v1314_v47, %v1307_v2  ;;  %v5979_v22 = vld [vmem:[#allocation5 + $0x1f8] sm:$0xff]  ;;  %v6002_v2 = vld [vmem:[#allocation5 + $0x170] sm:$0xff] }
  0x9f   :  { %4678 = vmatpush3.bf16.msra.mxu0 %v5803_v36  ;;  %7459 = vst [vmem:[#allocation21_spill] sm:$0xff] %v5945_v15  ;;  %v1327_v59 = vsub.f32 %v5913_v17, %v7279_v54  ;;  %v1195_v45 = vand.u32 4294901760, %v1194_v58  ;;  %v5983_v6 = vsub.f32 %v106_v48, %v1121_v42  ;;  %v40_v54 = vld [vmem:[#allocation2 + $0x10] sm:$0xff]  ;;  %v5989_v55 = vpack.c.bf16 %v1124_v57, %v1121_v42  ;;  %v6004_v42 = vld [vmem:[#allocation5 + $0x178] sm:$0xff] }
  0xa0   :  { %4670 = vmatpush3.bf16.msra.mxu1 %v7436_v28  ;;  %4680 = vmatprep.subr.bf16.mxu0 %v5825_v41  ;;  %v1320_v28 = vsub.f32 %v5895_v35, %v7280_v11  ;;  %v1202_v11 = vand.u32 4294901760, %v1201_v29  ;;  %v5991_v62 = vsub.f32 %v107_v53, %v1124_v57  ;;  %v5998_v58 = vsub.f32 %v5942_v8, %v7281_v27 }
  0xa1   :  { %4704 = vmatprep.subr.bf16.mxu1 %v5864_v13  ;;  %v5977_v13 = vld [vmem:[#allocation5 + $0x1f0] sm:$0xff]  ;;  %v1328_v53 = vand.u32 4294901760, %v1327_v59  ;;  %v7462_v29 = vand.u32 4294901760, %v5925_v30  ;;  %v7463_v57 = vand.u32 4294901760, %v5936_v52  ;;  %v6013_v27 = vand.u32 4294901760, %v40_v54 }
  0xa2   :  { %v1321_v48 = vand.u32 4294901760, %v1320_v28  ;;  %v1127_v47 = vand.u32 4294901760, %v5977_v13  ;;  %v7465_v41 = vand.u32 4294901760, %v5947_v34 }
  0xa3   :  { %1031 = vmatmul.mubr.f32.vlgmr.msra.gmra.mrb[4].mxu1 %v5587_v37  ;;  %4682 = vmatpush3.bf16.msra.mxu0 %v5838_v56  ;;  %v1076_v37 = vand.u32 4294901760, %v5969_v50  ;;  %v1215_v28 = vsub.f32 %v5936_v52, %v7463_v57  ;;  %v4717_v57 = vpack.c.bf16 %v1202_v11, %v1195_v45 }
  0xa4   :  { %4706 = vmatpush3.bf16.msra.mxu1 %v5866_v39  ;;  %4684 = vmatprep.subr.bf16.mxu0 %v5849_v44  ;;  %v1130_v39 = vand.u32 4294901760, %v5979_v22  ;;  %v7464_v44 = vand.u32 4294901760, %v5945_v15  ;;  %v1341_v59 = vsub.f32 %v5947_v34, %v7465_v41  ;;  %v6033_v41 = vsub.f32 %v5977_v13, %v1127_v47 }
  0xa5   :  { %4708 = vmatprep.subr.bf16.mxu1 %v5905_v31  ;;  %1373 = vmatprep.mubr.f32.mxu1 %v5805_v1  ;;  %v1208_v31 = vsub.f32 %v5925_v30, %v7462_v29  ;;  %v6027_v36 = vsub.f32 %v5969_v50, %v1076_v37  ;;  %v7302_v29 = vand.u32 4294901760, %v5991_v62  ;;  %v4719_v11 = vpack.c.bf16 %v1328_v53, %v1321_v48 }
  0xa6   :  { %v1334_v56 = vsub.f32 %v5945_v15, %v7464_v44  ;;  %v1082_v44 = vand.u32 4294901760, %v6004_v42  ;;  %v6036_v1 = vsub.f32 %v5979_v22, %v1130_v39  ;;  %v1216_v50 = vand.u32 4294901760, %v1215_v28 }
  0xa7   :  { %4686 = vmatpush3.bf16.msra.mxu0 %v5872_v49  ;;  %v1079_v49 = vand.u32 4294901760, %v6002_v2  ;;  %v1209_v45 = vand.u32 4294901760, %v1208_v31  ;;  %v7466_v13 = vand.u32 4294901760, %v5962_v16  ;;  %v7467_v22 = vand.u32 4294901760, %v5964_v51 }
  0xa8   :  { %4710 = vmatpush3.bf16.msra.mxu1 %v5923_v23  ;;  %4688 = vmatprep.subr.bf16.mxu0 %v5907_v46  ;;  %v6041_v46 = vsub.f32 %v40_v54, %v6013_v27  ;;  %v1335_v34 = vand.u32 4294901760, %v1334_v56  ;;  %v6056_v54 = vsub.f32 %v6004_v42, %v1082_v44  ;;  %v7468_v31 = vand.u32 4294901760, %v5983_v6 }
  0xa9   :  { %4712 = vmatprep.subr.bf16.mxu1 %v5932_v5  ;;  %v1342_v5 = vand.u32 4294901760, %v1341_v59  ;;  %v1222_v15 = vsub.f32 %v5962_v16, %v7466_v13  ;;  %v1229_v23 = vsub.f32 %v5964_v51, %v7467_v22  ;;  %v6053_v48 = vsub.f32 %v6002_v2, %v1079_v49 }
  0xaa   :  { %v1348_v28 = vsub.f32 %v5983_v6, %v7468_v31  ;;  %v1361_v59 = vand.u32 4294901760, %v6033_v41  ;;  %v7469_v42 = vand.u32 4294901760, %v5942_v8  ;;  %v6072_v22 = vpack.c.bf16 %v1130_v39, %v1127_v47 }
  0xab   :  { %4690 = vmatpush3.bf16.msra.mxu0 %v5934_v61  ;;  %v4721_v53 = vpack.c.bf16 %v1216_v50, %v1209_v45  ;;  %v4723_v31 = vpack.c.bf16 %v1342_v5, %v1335_v34  ;;  %v1223_v56 = vand.u32 4294901760, %v1222_v15  ;;  %v7471_v8 = vand.u32 4294901760, %v6027_v36 }
  0xac   :  { %4714 = vmatpush3.bf16.msra.mxu1 %v5954_v24  ;;  %4692 = vmatprep.subr.bf16.mxu0 %v5939_v32  ;;  %v1355_v24 = vsub.f32 %v5991_v62, %v7302_v29  ;;  %v6070_v13 = vpack.c.bf16 %v1076_v37, %v7469_v42  ;;  %v1230_v32 = vand.u32 4294901760, %v1229_v23  ;;  %v7470_v29 = vand.u32 4294901760, %v5998_v58 }
  0xad   :  { %4716 = vmatprep.subr.bf16.mxu1 %v4715_v4  ;;  %v1140_v4 = vand.u32 4294901760, %v6041_v46  ;;  %v1243_v47 = vsub.f32 %v6027_v36, %v7471_v8  ;;  %v7303_v37 = vand.u32 4294901760, %v6053_v48  ;;  %v7304_v39 = vand.u32 4294901760, %v6056_v54 }
  0xae   :  { %v1236_v2 = vsub.f32 %v5998_v58, %v7470_v29  ;;  %v1349_v45 = vand.u32 4294901760, %v1348_v28  ;;  %v1356_v34 = vand.u32 4294901760, %v1355_v24  ;;  %v1362_v15 = vsub.f32 %v6033_v41, %v1361_v59 }
  0xaf   :  { %4694 = vmatpush3.bf16.msra.mxu0 %v5956_v20  ;;  %v1141_v29 = vsub.f32 %v6041_v46, %v1140_v4  ;;  %v6095_v50 = vpack.c.bf16 %v1082_v44, %v1079_v49  ;;  %v4725_v5 = vpack.c.bf16 %v1230_v32, %v1223_v56  ;;  %v1244_v24 = vand.u32 4294901760, %v1243_v47 }
  0xb0   :  { %4718 = vmatpush3.bf16.msra.mxu1 %v4717_v57  ;;  %4696 = vmatprep.subr.bf16.mxu0 %v5989_v55  ;;  %v7472_v57 = vand.u32 4294901760, %v6036_v1  ;;  %v1237_v28 = vand.u32 4294901760, %v1236_v2  ;;  %v1250_v42 = vsub.f32 %v6053_v48, %v7303_v37  ;;  %v1257_v8 = vsub.f32 %v6056_v54, %v7304_v39 }
  0xb1   :  { %4720 = vmatprep.subr.bf16.mxu1 %v4719_v11  ;;  %v4735_v11 = vpack.c.bf16 %v5741_v12, %v5739_v43  ;;  %v4727_v49 = vpack.c.bf16 %v1356_v34, %v1349_v45  ;;  %v1363_v44 = vand.u32 4294901760, %v1362_v15  ;;  %v1142_v56 = vand.u32 4294901760, %v1141_v29  ;;  %v7473_v29 = vld [vmem:[#allocation11_spill] sm:$0xff] }
  0xb2   :  { %v1369_v23 = vsub.f32 %v6036_v1, %v7472_v57  ;;  %v4729_v2 = vpack.c.bf16 %v1244_v24, %v1237_v28  ;;  %v4739_v47 = vpack.c.bf16 %v5801_v25, %v5799_v21  ;;  %v1251_v57 = vand.u32 4294901760, %v1250_v42  ;;  %v7476_v24 = vld [vmem:[#allocation16_spill] sm:$0xff]  ;;  %v7477_v42 = vld [vmem:[#allocation21_spill] sm:$0xff] }
  0xb3   :  { %4698 = vmatpush3.bf16.msra.mxu0 %v6070_v13  ;;  %v1258_v37 = vand.u32 4294901760, %v1257_v8  ;;  %v4743_v34 = vpack.c.bf16 %v5829_v63, %v5827_v3  ;;  %v4745_v15 = vpack.c.bf16 %v5842_v10, %v5840_v60  ;;  %v4753_v28 = vpack.c.bf16 %v5936_v52, %v5925_v30  ;;  %v7478_v8 = vld [vmem:[#allocation22_spill] sm:$0xff] }
  0xb4   :  { %4722 = vmatpush3.bf16.msra.mxu1 %v4721_v53  ;;  %4700 = vmatprep.subr.bf16.mxu0 %v6072_v22  ;;  %v1370_v32 = vand.u32 4294901760, %v1369_v23  ;;  %v4737_v53 = vpack.c.bf16 %v5745_v33, %v5743_v7  ;;  %v4747_v23 = vpack.c.bf16 %v5860_v9, %v5858_v26 }
  0xb5   :  { %4724 = vmatprep.subr.bf16.mxu1 %v4723_v31  ;;  %v4741_v31 = vpack.c.bf16 %v5813_v38, %v5808_v40  ;;  %v4733_v45 = vpack.c.bf16 %v1258_v37, %v1251_v57  ;;  %v4749_v37 = vpack.c.bf16 %v5887_v18, %v5885_v14  ;;  %v4763_v57 = vpack.c.bf16 %v6036_v1, %v6033_v41 }
  0xb6   :  { %v4731_v39 = vpack.c.bf16 %v1370_v32, %v1363_v44  ;;  %v7479_v44 = vld [vmem:[#allocation14_spill] sm:$0xff]  ;;  %v4757_v32 = vpack.c.bf16 %v5964_v51, %v5962_v16 }
  0xb7   :  { %4702 = vmatpush3.bf16.msra.mxu0 %v6095_v50 }
  0xb8   :  { %4726 = vmatpush3.bf16.msra.mxu1 %v4725_v5  ;;  %4736 = vmatprep.subr.bf16.mxu0 %v4735_v11  ;;  %v7474_v5 = vld [vmem:[#allocation12_spill] sm:$0xff]  ;;  %v7475_v11 = vand.u32 4294901760, %v5832_v0 }
  0xb9   :  { %4728 = vmatprep.subr.bf16.mxu1 %v4727_v49  ;;  %v4755_v49 = vpack.c.bf16 %v7478_v8, %v7477_v42 }
  0xba   :  { %1143 = vmatmul.mubr.f32.vlgmr.msra.gmra.mrb[6].mxu0 %v1142_v56  ;;  %v7480_v56 = vld [vmem:[#allocation15_spill] sm:$0xff] }
  0xbb   :  { %4738 = vmatpush3.bf16.msra.mxu0 %v4737_v53  ;;  %1510 = vmatprep.mubr.f32.mxu0 %v5832_v0  ;;  %v4759_v0 = vpack.c.bf16 %v5991_v62, %v5983_v6  ;;  %v7481_v53 = vld [vmem:[#allocation17_spill] sm:$0xff] }
  0xbc   :  { %4730 = vmatpush3.bf16.msra.mxu1 %v4729_v2  ;;  %4740 = vmatprep.subr.bf16.mxu0 %v4739_v47  ;;  %v4761_v2 = vpack.c.bf16 %v6027_v36, %v5998_v58  ;;  %v7482_v47 = vld [vmem:[#allocation18_spill] sm:$0xff] }
  0xbd   :  { %4732 = vmatprep.subr.bf16.mxu1 %v4731_v39  ;;  %v4751_v39 = vpack.c.bf16 %v5913_v17, %v5895_v35 }
  0xbf   :  { %4742 = vmatpush3.bf16.msra.mxu0 %v4741_v31  ;;  %v7483_v31 = vld [vmem:[#allocation19_spill] sm:$0xff] }
  0xc0   :  { %4734 = vmatpush3.bf16.msra.mxu1 %v4733_v45  ;;  %4744 = vmatprep.subr.bf16.mxu0 %v4743_v34  ;;  %v4765_v45 = vpack.c.bf16 %v6056_v54, %v6053_v48  ;;  %v7484_v34 = vand.u32 4294901760, %v5739_v43  ;;  %v126_v43 = vld [vmem:[#allocation5 + $0x280] sm:$0xff] }
  0xc1   :  { %4768 = vmatprep.subr.bf16.mxu1 %v5787_v19 }
  0xc3   :  { %1375 = vmatmul.mubr.f32.vlgmr.msra.gmra.mrb[6].mxu1 %v6013_v27  ;;  %4746 = vmatpush3.bf16.msra.mxu0 %v4745_v15  ;;  %v7485_v15 = vand.u32 4294901760, %v5741_v12  ;;  %v7491_v12 = vand.u32 4294901760, %v5808_v40  ;;  %v7496_v40 = vand.u32 4294901760, %v5840_v60  ;;  %v7500_v60 = vand.u32 4294901760, %v5885_v14 }
  0xc4   :  { %4770 = vmatpush3.bf16.msra.mxu1 %v7473_v29  ;;  %4748 = vmatprep.subr.bf16.mxu0 %v4747_v23  ;;  %v7507_v14 = vand.u32 4294901760, %v7478_v8 }
  0xc5   :  { %4772 = vmatprep.subr.bf16.mxu1 %v7474_v5  ;;  %1617 = vmatprep.mubr.f32.mxu1 %v7475_v11  ;;  %v4799_v23 = vpack.c.bf16 %v7485_v15, %v7484_v34  ;;  %v7488_v11 = vand.u32 4294901760, %v5745_v33  ;;  %v1947_v34 = vand.u32 4294901760, %v126_v43  ;;  %v110_v15 = vld [vmem:[#allocation5 + $0x200] sm:$0xff] }
  0xc7   :  { %4750 = vmatpush3.bf16.msra.mxu0 %v4749_v37  ;;  %v7486_v37 = vld [vmem:[#allocation20_spill] sm:$0xff] }
  0xc8   :  { %4774 = vmatpush3.bf16.msra.mxu1 %v7476_v24  ;;  %4752 = vmatprep.subr.bf16.mxu0 %v4751_v39  ;;  %v7487_v39 = vand.u32 4294901760, %v5743_v7  ;;  %v7492_v7 = vand.u32 4294901760, %v5813_v38  ;;  %v7497_v38 = vand.u32 4294901760, %v5842_v10  ;;  %v7501_v10 = vand.u32 4294901760, %v5887_v18 }
  0xc9   :  { %4776 = vmatprep.subr.bf16.mxu1 %v7479_v44 }
  0xca   :  { %v4805_v33 = vpack.c.bf16 %v7492_v7, %v7491_v12  ;;  %v4813_v7 = vpack.c.bf16 %v7501_v10, %v7500_v60  ;;  %v131_v10 = vld [vmem:[#allocation5 + $0x2a8] sm:$0xff] }
  0xcb   :  { %4754 = vmatpush3.bf16.msra.mxu0 %v4753_v28  ;;  %v4801_v28 = vpack.c.bf16 %v7488_v11, %v7487_v39  ;;  %v4809_v39 = vpack.c.bf16 %v7497_v38, %v7496_v40  ;;  %v113_v40 = vld [vmem:[#allocation5 + $0x218] sm:$0xff]  ;;  %v7505_v38 = vand.u32 4294901760, %v5936_v52  ;;  %v7510_v52 = vand.u32 4294901760, %v5983_v6 }
  0xcc   :  { %4778 = vmatpush3.bf16.msra.mxu1 %v7480_v56  ;;  %4756 = vmatprep.subr.bf16.mxu0 %v4755_v49  ;;  %v7489_v49 = vand.u32 4294901760, %v5799_v21  ;;  %v7494_v21 = vand.u32 4294901760, %v5827_v3  ;;  %v7498_v3 = vand.u32 4294901760, %v5858_v26  ;;  %v112_v26 = vld [vmem:[#allocation5 + $0x210] sm:$0xff]  ;;  %v7512_v6 = vand.u32 4294901760, %v5998_v58 }
  0xcd   :  { %4780 = vmatprep.subr.bf16.mxu1 %v7481_v53  ;;  %v7516_v58 = vand.u32 4294901760, %v6056_v54 }
  0xcf   :  { %4758 = vmatpush3.bf16.msra.mxu0 %v4757_v32  ;;  %v7490_v32 = vand.u32 4294901760, %v5801_v25  ;;  %v7495_v25 = vand.u32 4294901760, %v5829_v63  ;;  %v7499_v63 = vand.u32 4294901760, %v5860_v9  ;;  %v7504_v9 = vand.u32 4294901760, %v5925_v30 }
  0xd0   :  { %4782 = vmatpush3.bf16.msra.mxu1 %v7482_v47  ;;  %4760 = vmatprep.subr.bf16.mxu0 %v4759_v0  ;;  %v7509_v30 = vand.u32 4294901760, %v5964_v51  ;;  %v43_v51 = vld [vmem:[#allocation2 + $0x28] sm:$0xff] }
  0xd1   :  { %4784 = vmatprep.subr.bf16.mxu1 %v7483_v31  ;;  %v4803_v0 = vpack.c.bf16 %v7490_v32, %v7489_v49  ;;  %v129_v49 = vld [vmem:[#allocation5 + $0x298] sm:$0xff]  ;;  %v4811_v32 = vpack.c.bf16 %v7499_v63, %v7498_v3  ;;  %v4817_v3 = vpack.c.bf16 %v7505_v38, %v7504_v9 }
  0xd2   :  { %v1956_v60 = vand.u32 4294901760, %v129_v49 }
  0xd3   :  { %4762 = vmatpush3.bf16.msra.mxu0 %v4761_v2  ;;  %v7493_v2 = vld [vmem:[#allocation13_spill] sm:$0xff] }
  0xd4   :  { %4786 = vmatpush3.bf16.msra.mxu1 %v5934_v61  ;;  %4764 = vmatprep.subr.bf16.mxu0 %v4763_v57  ;;  %v4807_v57 = vpack.c.bf16 %v7495_v25, %v7494_v21  ;;  %v7503_v21 = vand.u32 4294901760, %v5913_v17  ;;  %v7508_v17 = vand.u32 4294901760, %v5962_v16  ;;  %v1905_v16 = vand.u32 4294901760, %v112_v26 }
  0xd5   :  { %4788 = vmatprep.subr.bf16.mxu1 %v7486_v37  ;;  %v6250_v38 = vsub.f32 %v129_v49, %v1956_v60  ;;  %v133_v49 = vld [vmem:[#allocation5 + $0x2b8] sm:$0xff] }
  0xd7   :  { %4766 = vmatpush3.bf16.msra.mxu0 %v4765_v45  ;;  %v127_v45 = vld [vmem:[#allocation5 + $0x288] sm:$0xff] }
  0xd8   :  { %4790 = vmatpush3.bf16.msra.mxu1 %v5956_v20  ;;  %4800 = vmatprep.subr.bf16.mxu0 %v4799_v23  ;;  %v111_v23 = vld [vmem:[#allocation5 + $0x208] sm:$0xff]  ;;  %v1950_v11 = vand.u32 4294901760, %v127_v45 }
  0xd9   :  { %4792 = vmatprep.subr.bf16.mxu1 %v5989_v55  ;;  %v1902_v12 = vand.u32 4294901760, %v111_v23 }
  0xda   :  { %1513 = vmatmul.mubr.f32.vlgmr.msra.gmra.mrb[8].mxu0 %v6041_v46 }
  0xdb   :  { %4802 = vmatpush3.bf16.msra.mxu0 %v4801_v28  ;;  %1787 = vmatprep.mubr.f32.mxu0 %v7493_v2  ;;  %v128_v28 = vld [vmem:[#allocation5 + $0x290] sm:$0xff] }
  0xdc   :  { %4794 = vmatpush3.bf16.msra.mxu1 %v6070_v13  ;;  %4804 = vmatprep.subr.bf16.mxu0 %v4803_v0  ;;  %v1899_v0 = vand.u32 4294901760, %v110_v15  ;;  %v1953_v63 = vand.u32 4294901760, %v128_v28 }
  0xdd   :  { %4796 = vmatprep.subr.bf16.mxu1 %v6072_v22 }
  0xde   :  { %v6223_v46 = vsub.f32 %v110_v15, %v1899_v0 }
  0xdf   :  { %4806 = vmatpush3.bf16.msra.mxu0 %v4805_v33  ;;  %v7502_v33 = vand.u32 4294901760, %v5895_v35  ;;  %v130_v35 = vld [vmem:[#allocation5 + $0x2a0] sm:$0xff] }
  0xe0   :  { %4798 = vmatpush3.bf16.msra.mxu1 %v6095_v50  ;;  %4808 = vmatprep.subr.bf16.mxu0 %v4807_v57  ;;  %v6196_v57 = vsub.f32 %v126_v43, %v1947_v34  ;;  %v6212_v43 = vpack.c.bf16 %v7509_v30, %v7508_v17  ;;  %v7305_v17 = vand.u32 4294901760, %v6250_v38 }
  0xe1   :  { %4832 = vmatprep.subr.bf16.mxu1 %v5787_v19  ;;  %v4815_v25 = vpack.c.bf16 %v7503_v21, %v7502_v33  ;;  %v7506_v19 = vand.u32 4294901760, %v7477_v42  ;;  %v7511_v42 = vand.u32 4294901760, %v5991_v62  ;;  %v6220_v33 = vsub.f32 %v127_v45, %v1950_v11 }
  0xe2   :  { %v7513_v62 = vand.u32 4294901760, %v6027_v36  ;;  %v1959_v45 = vand.u32 4294901760, %v130_v35  ;;  %v7315_v15 = vand.u32 4294901760, %v6196_v57  ;;  %v6248_v36 = vsub.f32 %v128_v28, %v1953_v63 }
  0xe3   :  { %v4819_v18 = vpack.c.bf16 %v7507_v14, %v7506_v19  ;;  %1621 = vmatmul.mubr.f32.vlgmr.msra.gmra.mrb[8].mxu1 %v1140_v4  ;;  %4810 = vmatpush3.bf16.msra.mxu0 %v4809_v39  ;;  %v6218_v8 = vpack.c.bf16 %v7511_v42, %v7510_v52  ;;  %v6225_v4 = vsub.f32 %v111_v23, %v1902_v12  ;;  %v1908_v39 = vand.u32 4294901760, %v113_v40 }
  0xe4   :  { %4834 = vmatpush3.bf16.msra.mxu1 %v7473_v29  ;;  %4812 = vmatprep.subr.bf16.mxu0 %v4811_v32  ;;  %v6232_v21 = vpack.c.bf16 %v7513_v62, %v7512_v6  ;;  %v1962_v29 = vand.u32 4294901760, %v131_v10  ;;  %v7514_v23 = vand.u32 4294901760, %v6036_v1  ;;  %v6254_v19 = vpack.c.bf16 %v1902_v12, %v1899_v0  ;;  %v114_v1 = vld [vmem:[#allocation5 + $0x220] sm:$0xff] }
  0xe5   :  { %4836 = vmatprep.subr.bf16.mxu1 %v7474_v5  ;;  %1891 = vmatprep.mubr.f32.mxu1 %v7493_v2  ;;  %v7515_v5 = vand.u32 4294901760, %v6053_v48  ;;  %v6252_v2 = vpack.c.bf16 %v1950_v11, %v1947_v34  ;;  %v7313_v41 = vand.u32 4294901760, %v6220_v33  ;;  %v6257_v14 = vand.u32 4294901760, %v43_v51  ;;  %v132_v11 = vld [vmem:[#allocation5 + $0x2b0] sm:$0xff] }
  0xe6   :  { %v6240_v32 = vpack.c.bf16 %v7514_v23, %v1361_v59  ;;  %7517 = vst [vmem:[#allocation11_spill] sm:$0xff] %v6254_v19  ;;  %v115_v59 = vld [vmem:[#allocation5 + $0x228] sm:$0xff]  ;;  %v6260_v48 = vpack.c.bf16 %v1956_v60, %v1953_v63  ;;  %v6262_v54 = vpack.c.bf16 %v1908_v39, %v1905_v16  ;;  %v7310_v28 = vand.u32 4294901760, %v6223_v46 }
  0xe7   :  { %v6246_v9 = vpack.c.bf16 %v7516_v58, %v7515_v5  ;;  %4814 = vmatpush3.bf16.msra.mxu0 %v4813_v7  ;;  %7518 = vst [vmem:[#allocation12_spill] sm:$0xff] %v6257_v14  ;;  %v7309_v34 = vand.u32 4294901760, %v6225_v4  ;;  %v6267_v0 = vsub.f32 %v112_v26, %v1905_v16  ;;  %v6269_v12 = vsub.f32 %v113_v40, %v1908_v39 }
  0xe8   :  { %4838 = vmatpush3.bf16.msra.mxu1 %v7476_v24  ;;  %4816 = vmatprep.subr.bf16.mxu0 %v4815_v25  ;;  %7519 = vst [vmem:[#allocation16_spill] sm:$0xff] %v6260_v48  ;;  %7520 = vst [vmem:[#allocation21_spill] sm:$0xff] %v6262_v54  ;;  %v6271_v7 = vpack.c.bf16 %v1962_v29, %v1959_v45  ;;  %v2126_v24 = vsub.f32 %v6196_v57, %v7315_v15  ;;  %v1911_v25 = vand.u32 4294901760, %v114_v1 }
  0xe9   :  { %4840 = vmatprep.subr.bf16.mxu1 %v7479_v44  ;;  %v1914_v63 = vand.u32 4294901760, %v115_v59  ;;  %v7306_v60 = vand.u32 4294901760, %v6248_v36  ;;  %v2133_v44 = vsub.f32 %v6220_v33, %v7313_v41  ;;  %v1965_v26 = vand.u32 4294901760, %v132_v11 }
  0xea   :  { %7521 = vst [vmem:[#allocation22_spill] sm:$0xff] %v6271_v7  ;;  %v1968_v40 = vand.u32 4294901760, %v133_v49  ;;  %v6282_v30 = vsub.f32 %v43_v51, %v6257_v14  ;;  %v6285_v52 = vsub.f32 %v130_v35, %v1959_v45  ;;  %v2014_v42 = vsub.f32 %v6223_v46, %v7310_v28  ;;  %v116_v51 = vld [vmem:[#allocation5 + $0x230] sm:$0xff]  ;;  %v119_v28 = vld [vmem:[#allocation5 + $0x248] sm:$0xff] }
  0xeb   :  { %4818 = vmatpush3.bf16.msra.mxu0 %v4817_v3  ;;  %v2021_v3 = vsub.f32 %v6225_v4, %v7309_v34  ;;  %v6294_v16 = vsub.f32 %v131_v10, %v1962_v29  ;;  %v2127_v39 = vand.u32 4294901760, %v2126_v24  ;;  %v7308_v6 = vand.u32 4294901760, %v6267_v0  ;;  %v117_v10 = vld [vmem:[#allocation5 + $0x238] sm:$0xff] }
  0xec   :  { %4842 = vmatpush3.bf16.msra.mxu1 %v7480_v56  ;;  %4820 = vmatprep.subr.bf16.mxu0 %v4819_v18  ;;  %v7307_v56 = vand.u32 4294901760, %v6269_v12  ;;  %v6298_v18 = vpack.c.bf16 %v1914_v63, %v1911_v25  ;;  %v6300_v35 = vsub.f32 %v114_v1, %v1911_v25  ;;  %v2140_v62 = vsub.f32 %v6248_v36, %v7306_v60  ;;  %v135_v60 = vld [vmem:[#allocation5 + $0x2c8] sm:$0xff] }
  0xed   :  { %4844 = vmatprep.subr.bf16.mxu1 %v7481_v53  ;;  %v2147_v53 = vsub.f32 %v6250_v38, %v7305_v17  ;;  %v2134_v45 = vand.u32 4294901760, %v2133_v44  ;;  %v6309_v29 = vsub.f32 %v115_v59, %v1914_v63  ;;  %v6311_v23 = vpack.c.bf16 %v1968_v40, %v1965_v26  ;;  %v134_v17 = vld [vmem:[#allocation5 + $0x2c0] sm:$0xff] }
  0xee   :  { %7522 = vst [vmem:[#allocation14_spill] sm:$0xff] %v6298_v18  ;;  %v7316_v5 = vand.u32 4294901760, %v6282_v30  ;;  %v2015_v58 = vand.u32 4294901760, %v2014_v42  ;;  %v2022_v1 = vand.u32 4294901760, %v2021_v3  ;;  %v6316_v24 = vsub.f32 %v132_v11, %v1965_v26  ;;  %v118_v42 = vld [vmem:[#allocation5 + $0x240] sm:$0xff] }
  0xef   :  { %4822 = vmatpush3.bf16.msra.mxu0 %v6212_v43  ;;  %7523 = vst [vmem:[#allocation15_spill] sm:$0xff] %v6311_v23  ;;  %v1917_v25 = vand.u32 4294901760, %v116_v51  ;;  %v6319_v43 = vsub.f32 %v133_v49, %v1968_v40  ;;  %v1920_v59 = vand.u32 4294901760, %v117_v10  ;;  %v2028_v63 = vsub.f32 %v6267_v0, %v7308_v6 }
  0xf0   :  { %4846 = vmatpush3.bf16.msra.mxu1 %v7482_v47  ;;  %4824 = vmatprep.subr.bf16.mxu0 %v6218_v8  ;;  %v2035_v47 = vsub.f32 %v6269_v12, %v7307_v56  ;;  %v2141_v8 = vand.u32 4294901760, %v2140_v62  ;;  %v2148_v44 = vand.u32 4294901760, %v2147_v53  ;;  %v7312_v11 = vand.u32 4294901760, %v6285_v52 }
  0xf1   :  { %4848 = vmatprep.subr.bf16.mxu1 %v7483_v31  ;;  %v7311_v26 = vand.u32 4294901760, %v6294_v16  ;;  %v6330_v31 = vpack.c.bf16 %v2134_v45, %v2127_v39  ;;  %v1971_v49 = vand.u32 4294901760, %v134_v17  ;;  %v1974_v40 = vand.u32 4294901760, %v135_v60 }
  0xf2   :  { %v1997_v3 = vsub.f32 %v6282_v30, %v7316_v5  ;;  %v6337_v62 = vpack.c.bf16 %v2022_v1, %v2015_v58  ;;  %v6339_v53 = vsub.f32 %v116_v51, %v1917_v25  ;;  %v7314_v56 = vand.u32 4294901760, %v6300_v35  ;;  %v137_v1 = vld [vmem:[#allocation5 + $0x2d8] sm:$0xff] }
  0xf3   :  { %4826 = vmatpush3.bf16.msra.mxu0 %v6232_v21  ;;  %v7317_v21 = vand.u32 4294901760, %v6309_v29  ;;  %v6344_v39 = vpack.c.bf16 %v1920_v59, %v1917_v25  ;;  %v6346_v45 = vsub.f32 %v117_v10, %v1920_v59  ;;  %v2029_v6 = vand.u32 4294901760, %v2028_v63  ;;  %v136_v10 = vld [vmem:[#allocation5 + $0x2d0] sm:$0xff]  ;;  %v121_v5 = vld [vmem:[#allocation5 + $0x258] sm:$0xff] }
  0xf4   :  { %4850 = vmatpush3.bf16.msra.mxu1 %v5934_v61  ;;  %4828 = vmatprep.subr.bf16.mxu0 %v6240_v32  ;;  %v2036_v34 = vand.u32 4294901760, %v2035_v47  ;;  %v6348_v61 = vpack.c.bf16 %v2148_v44, %v2141_v8  ;;  %v2154_v32 = vsub.f32 %v6285_v52, %v7312_v11  ;;  %v2161_v51 = vsub.f32 %v6294_v16, %v7311_v26 }
  0xf5   :  { %4852 = vmatprep.subr.bf16.mxu1 %v7486_v37  ;;  %7524 = vst [vmem:[#allocation17_spill] sm:$0xff] %v6344_v39  ;;  %v1923_v58 = vand.u32 4294901760, %v118_v42  ;;  %v6357_v37 = vpack.c.bf16 %v1974_v40, %v1971_v49  ;;  %v7319_v25 = vand.u32 4294901760, %v6316_v24  ;;  %v7318_v59 = vand.u32 4294901760, %v6319_v43 }
  0xf6   :  { %v1998_v63 = vand.u32 4294901760, %v1997_v3  ;;  %v6363_v47 = vsub.f32 %v134_v17, %v1971_v49  ;;  %v1926_v8 = vand.u32 4294901760, %v119_v28  ;;  %v2049_v44 = vsub.f32 %v6309_v29, %v7317_v21 }
  0xf7   :  { %4830 = vmatpush3.bf16.msra.mxu0 %v6246_v9  ;;  %7525 = vst [vmem:[#allocation18_spill] sm:$0xff] %v6357_v37  ;;  %v2042_v9 = vsub.f32 %v6300_v35, %v7314_v56  ;;  %v6372_v26 = vpack.c.bf16 %v2036_v34, %v2029_v6  ;;  %v6374_v3 = vsub.f32 %v135_v60, %v1974_v40  ;;  %v7322_v11 = vand.u32 4294901760, %v6339_v53 }
  0xf8   :  { %4854 = vmatpush3.bf16.msra.mxu1 %v5956_v20  ;;  %4864 = vmatprep.subr.bf16.mxu0 %v6252_v2  ;;  %v120_v20 = vld [vmem:[#allocation5 + $0x250] sm:$0xff]  ;;  %v7325_v17 = vand.u32 4294901760, %v6346_v45  ;;  %v2155_v49 = vand.u32 4294901760, %v2154_v32  ;;  %v2162_v41 = vand.u32 4294901760, %v2161_v51  ;;  %v1977_v56 = vand.u32 4294901760, %v136_v10 }
  0xf9   :  { %4856 = vmatprep.subr.bf16.mxu1 %v5989_v55  ;;  %v1980_v15 = vand.u32 4294901760, %v137_v1  ;;  %v6380_v21 = vsub.f32 %v118_v42, %v1923_v58  ;;  %v2168_v55 = vsub.f32 %v6316_v24, %v7319_v25  ;;  %v2175_v34 = vsub.f32 %v6319_v43, %v7318_v59  ;;  %v138_v59 = vld [vmem:[#allocation5 + $0x2e0] sm:$0xff] }
  0xfa   :  { %1789 = vmatmul.mubr.f32.vlgmr.msra.gmra.mrb[10].mxu0 %v6013_v27  ;;  %v6390_v60 = vpack.c.bf16 %v1926_v8, %v1923_v58  ;;  %v2043_v6 = vand.u32 4294901760, %v2042_v9  ;;  %v2050_v40 = vand.u32 4294901760, %v2049_v44  ;;  %v1929_v32 = vand.u32 4294901760, %v120_v20  ;;  %v6418_v25 = vld [vmem:[#allocation5 + $0x260] sm:$0xff] }
  0xfb   :  { %4866 = vmatpush3.bf16.msra.mxu0 %v6254_v19  ;;  %1999 = vmatprep.mubr.f32.mxu0 %v1998_v63  ;;  %v1932_v42 = vand.u32 4294901760, %v121_v5  ;;  %v2056_v51 = vsub.f32 %v6339_v53, %v7322_v11  ;;  %v2063_v63 = vsub.f32 %v6346_v45, %v7325_v17  ;;  %v6400_v58 = vpack.c.bf16 %v2162_v41, %v2155_v49 }
  0xfc   :  { %4858 = vmatpush3.bf16.msra.mxu1 %v6070_v13  ;;  %4868 = vmatprep.subr.bf16.mxu0 %v6260_v48  ;;  %v139_v13 = vld [vmem:[#allocation5 + $0x2e8] sm:$0xff]  ;;  %v6402_v9 = vsub.f32 %v119_v28, %v1926_v8  ;;  %v6404_v44 = vpack.c.bf16 %v1980_v15, %v1977_v56  ;;  %v6408_v48 = vsub.f32 %v136_v10, %v1977_v56  ;;  %v2169_v19 = vand.u32 4294901760, %v2168_v55 }
  0xfd   :  { %4860 = vmatprep.subr.bf16.mxu1 %v6072_v22  ;;  %v7326_v22 = vand.u32 4294901760, %v6374_v3  ;;  %v6410_v11 = vsub.f32 %v137_v1, %v1980_v15  ;;  %v2176_v17 = vand.u32 4294901760, %v2175_v34  ;;  %v6414_v41 = vpack.c.bf16 %v2050_v40, %v2043_v6  ;;  %v6426_v55 = vld [vmem:[#allocation5 + $0x268] sm:$0xff]  ;;  %v6435_v40 = vld [vmem:[#allocation5 + $0x2f0] sm:$0xff] }
  0xfe   :  { %7526 = vst [vmem:[#allocation19_spill] sm:$0xff] %v6408_v48  ;;  %v6416_v28 = vsub.f32 %v120_v20, %v1929_v32  ;;  %v1983_v8 = vand.u32 4294901760, %v138_v59  ;;  %v1986_v49 = vand.u32 4294901760, %v139_v13  ;;  %v6421_v56 = vpack.c.bf16 %v1932_v42, %v1929_v32  ;;  %v6437_v32 = vld [vmem:[#allocation5 + $0x2f8] sm:$0xff] }
  0xff   :  { %4870 = vmatpush3.bf16.msra.mxu0 %v6262_v54  ;;  %7527 = vst [vmem:[#allocation20_spill] sm:$0xff] %v6410_v11  ;;  %v2057_v15 = vand.u32 4294901760, %v2056_v51  ;;  %v2064_v10 = vand.u32 4294901760, %v2063_v63  ;;  %v7528_v1 = vand.u32 4294901760, %v6363_v47  ;;  %v6428_v34 = vsub.f32 %v121_v5, %v1932_v42 }
 0x100   :  { %4862 = vmatpush3.bf16.msra.mxu1 %v6095_v50  ;;  %4872 = vmatprep.subr.bf16.mxu0 %v6271_v7  ;;  %v2189_v20 = vsub.f32 %v6374_v3, %v7326_v22  ;;  %v4907_v51 = vpack.c.bf16 %v2176_v17, %v2169_v19  ;;  %v1935_v5 = vand.u32 4294901760, %v6418_v25  ;;  %v6446_v22 = vpack.c.bf16 %v1986_v49, %v1983_v8 }
 0x101   :  { %4896 = vmatprep.subr.bf16.mxu1 %v6330_v31  ;;  %v2182_v50 = vsub.f32 %v6363_v47, %v7528_v1  ;;  %v42_v1 = vld [vmem:[#allocation2 + $0x20] sm:$0xff]  ;;  %v6448_v31 = vsub.f32 %v138_v59, %v1983_v8  ;;  %v6450_v6 = vsub.f32 %v139_v13, %v1986_v49  ;;  %v4909_v19 = vpack.c.bf16 %v2064_v10, %v2057_v15 }
 0x102   :  { %v1989_v42 = vand.u32 4294901760, %v6435_v40  ;;  %v1992_v63 = vand.u32 4294901760, %v6437_v32  ;;  %v2190_v59 = vand.u32 4294901760, %v2189_v20  ;;  %v7529_v13 = vand.u32 4294901760, %v6380_v21 }
 0x103   :  { %1893 = vmatmul.mubr.f32.vlgmr.msra.gmra.mrb[10].mxu1 %v6013_v27  ;;  %4874 = vmatpush3.bf16.msra.mxu0 %v6298_v18  ;;  %v1938_v27 = vand.u32 4294901760, %v6426_v55  ;;  %v2183_v17 = vand.u32 4294901760, %v2182_v50  ;;  %v6456_v18 = vld [vmem:[#allocation5 + $0x270] sm:$0xff]  ;;  %v7530_v49 = vand.u32 4294901760, %v6402_v9  ;;  %v6467_v15 = vand.u32 4294901760, %v42_v1 }
 0x104   :  { %4898 = vmatpush3.bf16.msra.mxu1 %v6337_v62  ;;  %4876 = vmatprep.subr.bf16.mxu0 %v6311_v23  ;;  %v6458_v62 = vld [vmem:[#allocation5 + $0x278] sm:$0xff]  ;;  %v2070_v8 = vsub.f32 %v6380_v21, %v7529_v13  ;;  %v7531_v10 = vand.u32 4294901760, %v6408_v48  ;;  %v7532_v23 = vand.u32 4294901760, %v6410_v11  ;;  %v6493_v13 = vsub.f32 %v6437_v32, %v1992_v63 }
 0x105   :  { %4900 = vmatprep.subr.bf16.mxu1 %v6348_v61  ;;  %2235 = vmatprep.mubr.f32.mxu1 %v6257_v14  ;;  %v2077_v61 = vsub.f32 %v6402_v9, %v7530_v49  ;;  %v6481_v49 = vsub.f32 %v6418_v25, %v1935_v5  ;;  %v1944_v7 = vand.u32 4294901760, %v6458_v62  ;;  %v7345_v25 = vand.u32 4294901760, %v6450_v6 }
 0x106   :  { %v2196_v50 = vsub.f32 %v6408_v48, %v7531_v10  ;;  %v2203_v20 = vsub.f32 %v6410_v11, %v7532_v23  ;;  %v1941_v10 = vand.u32 4294901760, %v6456_v18  ;;  %v6490_v23 = vsub.f32 %v6435_v40, %v1989_v42 }
 0x107   :  { %4878 = vmatpush3.bf16.msra.mxu0 %v6344_v39  ;;  %v6484_v39 = vsub.f32 %v6426_v55, %v1938_v27  ;;  %v4911_v14 = vpack.c.bf16 %v2190_v59, %v2183_v17  ;;  %v2078_v55 = vand.u32 4294901760, %v2077_v61  ;;  %v6498_v11 = vsub.f32 %v42_v1, %v6467_v15 }
 0x108   :  { %4902 = vmatpush3.bf16.msra.mxu1 %v6372_v26  ;;  %4880 = vmatprep.subr.bf16.mxu0 %v6357_v37  ;;  %v2071_v37 = vand.u32 4294901760, %v2070_v8  ;;  %v2197_v48 = vand.u32 4294901760, %v2196_v50  ;;  %v7533_v40 = vand.u32 4294901760, %v6416_v28  ;;  %v7534_v32 = vand.u32 4294901760, %v6428_v34 }
 0x109   :  { %4904 = vmatprep.subr.bf16.mxu1 %v6400_v58  ;;  %v2204_v58 = vand.u32 4294901760, %v2203_v20  ;;  %v6510_v17 = vsub.f32 %v6456_v18, %v1941_v10  ;;  %v6513_v1 = vsub.f32 %v6458_v62, %v1944_v7  ;;  %v7535_v61 = vand.u32 4294901760, %v6448_v31 }
 0x10a   :  { %v2084_v54 = vsub.f32 %v6416_v28, %v7533_v40  ;;  %v2091_v26 = vsub.f32 %v6428_v34, %v7534_v32  ;;  %v7347_v18 = vand.u32 4294901760, %v6493_v13  ;;  %v6525_v40 = vpack.c.bf16 %v1938_v27, %v1935_v5 }
 0x10b   :  { %4882 = vmatpush3.bf16.msra.mxu0 %v6390_v60  ;;  %v2210_v50 = vsub.f32 %v6448_v31, %v7535_v61  ;;  %v6527_v62 = vpack.c.bf16 %v1992_v63, %v1989_v42  ;;  %v7349_v32 = vand.u32 4294901760, %v6498_v11  ;;  %v4915_v8 = vpack.c.bf16 %v2204_v58, %v2197_v48 }
 0x10c   :  { %4906 = vmatpush3.bf16.msra.mxu1 %v6414_v41  ;;  %4884 = vmatprep.subr.bf16.mxu0 %v6404_v44  ;;  %v2217_v41 = vsub.f32 %v6450_v6, %v7345_v25  ;;  %v2085_v59 = vand.u32 4294901760, %v2084_v54  ;;  %v2092_v61 = vand.u32 4294901760, %v2091_v26  ;;  %v7536_v25 = vand.u32 4294901760, %v6481_v49 }
 0x10d   :  { %4908 = vmatprep.subr.bf16.mxu1 %v4907_v51  ;;  %v4913_v51 = vpack.c.bf16 %v2078_v55, %v2071_v37  ;;  %v7537_v5 = vand.u32 4294901760, %v6484_v39  ;;  %v7346_v63 = vand.u32 4294901760, %v6510_v17  ;;  %v7348_v27 = vand.u32 4294901760, %v6513_v1 }
 0x10e   :  { %v2098_v20 = vsub.f32 %v6481_v49, %v7536_v25  ;;  %v2211_v37 = vand.u32 4294901760, %v2210_v50  ;;  %v2218_v48 = vand.u32 4294901760, %v2217_v41  ;;  %v7538_v54 = vand.u32 4294901760, %v6490_v23 }
 0x10f   :  { %4886 = vmatpush3.bf16.msra.mxu0 %v6421_v56  ;;  %v2105_v42 = vsub.f32 %v6484_v39, %v7537_v5  ;;  %v2231_v26 = vsub.f32 %v6493_v13, %v7347_v18  ;;  %v2003_v25 = vsub.f32 %v6498_v11, %v7349_v32  ;;  %v6550_v55 = vpack.c.bf16 %v1944_v7, %v1941_v10  ;;  %v6625_v32 = vld [vmem:[#allocation5 + $0x300] sm:$0xff] }
 0x110   :  { %4910 = vmatpush3.bf16.msra.mxu1 %v4909_v19  ;;  %4888 = vmatprep.subr.bf16.mxu0 %v6446_v22  ;;  %v2224_v19 = vsub.f32 %v6490_v23, %v7538_v54  ;;  %v4917_v58 = vpack.c.bf16 %v2092_v61, %v2085_v59  ;;  %v2099_v50 = vand.u32 4294901760, %v2098_v20  ;;  %v2112_v5 = vsub.f32 %v6510_v17, %v7346_v63 }
 0x111   :  { %4912 = vmatprep.subr.bf16.mxu1 %v4911_v14  ;;  %v4927_v14 = vpack.c.bf16 %v6220_v33, %v6196_v57  ;;  %v2106_v41 = vand.u32 4294901760, %v2105_v42  ;;  %v2119_v54 = vsub.f32 %v6513_v1, %v7348_v27  ;;  %v4919_v7 = vpack.c.bf16 %v2218_v48, %v2211_v37 }
 0x112   :  { %v2225_v10 = vand.u32 4294901760, %v2224_v19  ;;  %v2232_v59 = vand.u32 4294901760, %v2231_v26  ;;  %v2004_v61 = vand.u32 4294901760, %v2003_v25  ;;  %v4931_v42 = vpack.c.bf16 %v6250_v38, %v6248_v36  ;;  %v7540_v25 = vld [vmem:[#allocation16_spill] sm:$0xff] }
 0x113   :  { %4890 = vmatpush3.bf16.msra.mxu0 %v6525_v40  ;;  %v4921_v20 = vpack.c.bf16 %v2106_v41, %v2099_v50  ;;  %v2113_v63 = vand.u32 4294901760, %v2112_v5  ;;  %v2120_v18 = vand.u32 4294901760, %v2119_v54  ;;  %v4935_v48 = vpack.c.bf16 %v6294_v16, %v6285_v52  ;;  %v7542_v50 = vld [vmem:[#allocation21_spill] sm:$0xff]  ;;  %v7543_v41 = vld [vmem:[#allocation19_spill] sm:$0xff]  ;;  %v7544_v5 = vld [vmem:[#allocation20_spill] sm:$0xff] }
 0x114   :  { %4914 = vmatpush3.bf16.msra.mxu1 %v4913_v51  ;;  %4892 = vmatprep.subr.bf16.mxu0 %v6527_v62  ;;  %v4929_v51 = vpack.c.bf16 %v6225_v4, %v6223_v46  ;;  %v4923_v27 = vpack.c.bf16 %v2232_v59, %v2225_v10  ;;  %v4937_v19 = vpack.c.bf16 %v6309_v29, %v6300_v35  ;;  %v7546_v59 = vld [vmem:[#allocation14_spill] sm:$0xff] }
 0x115   :  { %4916 = vmatprep.subr.bf16.mxu1 %v4915_v8  ;;  %v4933_v8 = vpack.c.bf16 %v6269_v12, %v6267_v0  ;;  %v4925_v37 = vpack.c.bf16 %v2120_v18, %v2113_v63  ;;  %v4939_v26 = vpack.c.bf16 %v6319_v43, %v6316_v24  ;;  %v4941_v18 = vpack.c.bf16 %v6346_v45, %v6339_v53  ;;  %v7539_v63 = vld [vmem:[#allocation11_spill] sm:$0xff] }
 0x116   :  { %v4947_v54 = vpack.c.bf16 %v7544_v5, %v7543_v41  ;;  %v4949_v10 = vpack.c.bf16 %v6428_v34, %v6416_v28 }
 0x117   :  { %4894 = vmatpush3.bf16.msra.mxu0 %v6550_v55 }
 0x118   :  { %4918 = vmatpush3.bf16.msra.mxu1 %v4917_v58  ;;  %4928 = vmatprep.subr.bf16.mxu0 %v4927_v14  ;;  %v7541_v58 = vand.u32 4294901760, %v6282_v30  ;;  %v4945_v14 = vpack.c.bf16 %v6402_v9, %v6380_v21 }
 0x119   :  { %4920 = vmatprep.subr.bf16.mxu1 %v4919_v7  ;;  %v7545_v7 = vld [vmem:[#allocation22_spill] sm:$0xff] }
 0x11a   :  { %2005 = vmatmul.mubr.f32.vlgmr.msra.gmra.mrb[12].mxu0 %v2004_v61  ;;  %v7547_v61 = vld [vmem:[#allocation15_spill] sm:$0xff] }
 0x11b   :  { %4930 = vmatpush3.bf16.msra.mxu0 %v4929_v51  ;;  %2372 = vmatprep.mubr.f32.mxu0 %v6282_v30  ;;  %v4951_v30 = vpack.c.bf16 %v6450_v6, %v6448_v31 }
 0x11c   :  { %4922 = vmatpush3.bf16.msra.mxu1 %v4921_v20  ;;  %4932 = vmatprep.subr.bf16.mxu0 %v4931_v42  ;;  %v4953_v42 = vpack.c.bf16 %v6484_v39, %v6481_v49 }
 0x11d   :  { %4924 = vmatprep.subr.bf16.mxu1 %v4923_v27  ;;  %v4943_v27 = vpack.c.bf16 %v6374_v3, %v6363_v47 }
 0x11f   :  { %4934 = vmatpush3.bf16.msra.mxu0 %v4933_v8 }
 0x120   :  { %4926 = vmatpush3.bf16.msra.mxu1 %v4925_v37  ;;  %4936 = vmatprep.subr.bf16.mxu0 %v4935_v48  ;;  %v7548_v37 = vld [vmem:[#allocation17_spill] sm:$0xff]  ;;  %v4955_v48 = vpack.c.bf16 %v6493_v13, %v6490_v23 }
 0x121   :  { %4960 = vmatprep.subr.bf16.mxu1 %v6252_v2 }
 0x123   :  { %2237 = vmatmul.mubr.f32.vlgmr.msra.gmra.mrb[12].mxu1 %v6467_v15  ;;  %4938 = vmatpush3.bf16.msra.mxu0 %v4937_v19  ;;  %v7549_v19 = vld [vmem:[#allocation18_spill] sm:$0xff] }
 0x124   :  { %4962 = vmatpush3.bf16.msra.mxu1 %v7539_v63  ;;  %4940 = vmatprep.subr.bf16.mxu0 %v4939_v26  ;;  %v4957_v26 = vpack.c.bf16 %v6513_v1, %v6510_v17 }
 0x125   :  { %4964 = vmatprep.subr.bf16.mxu1 %v7540_v25  ;;  %2479 = vmatprep.mubr.f32.mxu1 %v7541_v58 }
 0x127   :  { %4942 = vmatpush3.bf16.msra.mxu0 %v4941_v18  ;;  %v7550_v18 = vand.u32 4294901760, %v6196_v57  ;;  %v7554_v57 = vand.u32 4294901760, %v6248_v36  ;;  %v7556_v36 = vand.u32 4294901760, %v6267_v0 }
 0x128   :  { %4966 = vmatpush3.bf16.msra.mxu1 %v7542_v50  ;;  %4944 = vmatprep.subr.bf16.mxu0 %v4943_v27  ;;  %v7551_v27 = vand.u32 4294901760, %v6220_v33  ;;  %v7555_v33 = vand.u32 4294901760, %v6250_v38  ;;  %v7557_v38 = vand.u32 4294901760, %v6269_v12 }
 0x129   :  { %4968 = vmatprep.subr.bf16.mxu1 %v7545_v7 }
 0x12a   :  { %v4991_v58 = vpack.c.bf16 %v7551_v27, %v7550_v18  ;;  %v4995_v18 = vpack.c.bf16 %v7555_v33, %v7554_v57  ;;  %v7562_v57 = vand.u32 4294901760, %v6309_v29 }
 0x12b   :  { %4946 = vmatpush3.bf16.msra.mxu0 %v4945_v14  ;;  %v6611_v14 = vld [vmem:[#allocation5 + $0x380] sm:$0xff] }
 0x12c   :  { %4970 = vmatpush3.bf16.msra.mxu1 %v7546_v59  ;;  %4948 = vmatprep.subr.bf16.mxu0 %v4947_v54  ;;  %v7353_v27 = vand.u32 4294901760, %v6611_v14 }
 0x12d   :  { %4972 = vmatprep.subr.bf16.mxu1 %v7547_v61  ;;  %v3671_v51 = vpop.f32.mrb[0].mxu0 }
 0x12e   :  { %v3672_v20 = vpop.f32.mrb[1].mxu0 }
 0x12f   :  { %4950 = vmatpush3.bf16.msra.mxu0 %v4949_v10  ;;  %v3673_v8 = vadd.f32 %v3672_v20, %v3671_v51  ;;  %v6613_v10 = vld [vmem:[#allocation5 + $0x388] sm:$0xff]  ;;  %v7552_v51 = vand.u32 4294901760, %v6223_v46  ;;  %v7553_v20 = vand.u32 4294901760, %v6225_v4 }
 0x130   :  { %4974 = vmatpush3.bf16.msra.mxu1 %v7548_v37  ;;  %4952 = vmatprep.subr.bf16.mxu0 %v4951_v30  ;;  %v7352_v46 = vand.u32 4294901760, %v6613_v10 }
 0x131   :  { %4976 = vmatprep.subr.bf16.mxu1 %v7549_v19 }
 0x132   :  { %v6655_v12 = vsub.f32 %v6613_v10, %v7352_v46 }
 0x133   :  { %4954 = vmatpush3.bf16.msra.mxu0 %v4953_v42  ;;  %v4993_v42 = vpack.c.bf16 %v7553_v20, %v7552_v51  ;;  %v7559_v51 = vand.u32 4294901760, %v6285_v52  ;;  %v6659_v52 = vld [vmem:[#allocation5 + $0x398] sm:$0xff] }
 0x134   :  { %4978 = vmatpush3.bf16.msra.mxu1 %v6390_v60  ;;  %4956 = vmatprep.subr.bf16.mxu0 %v4955_v48 }
 0x135   :  { %4980 = vmatprep.subr.bf16.mxu1 %v6404_v44 }
 0x136   :  { %v3706_v54 = vpop.f32.mrb[0].mxu1 }
 0x137   :  { %v3707_v30 = vpop.f32.mrb[1].mxu1  ;;  %4958 = vmatpush3.bf16.msra.mxu0 %v4957_v26  ;;  %v6629_v26 = vld [vmem:[#allocation5 + $0x308] sm:$0xff] }
 0x138   :  { %v3708_v48 = vadd.f32 %v3707_v30, %v3706_v54  ;;  %4982 = vmatpush3.bf16.msra.mxu1 %v6421_v56  ;;  %4992 = vmatprep.subr.bf16.mxu0 %v4991_v58  ;;  %v4997_v58 = vpack.c.bf16 %v7557_v38, %v7556_v36  ;;  %v7558_v54 = vld [vmem:[#allocation12_spill] sm:$0xff]  ;;  %v7351_v30 = vand.u32 4294901760, %v6625_v32  ;;  %v7350_v0 = vand.u32 4294901760, %v6629_v26 }
 0x139   :  { %4984 = vmatprep.subr.bf16.mxu1 %v6446_v22  ;;  %v144_v36 = vld [vmem:[#allocation5 + $0x310] sm:$0xff]  ;;  %v7563_v38 = vand.u32 4294901760, %v6316_v24  ;;  %v7565_v24 = vand.u32 4294901760, %v6339_v53  ;;  %v7572_v53 = vand.u32 4294901760, %v7543_v41  ;;  %v163_v41 = vld [vmem:[#allocation5 + $0x3a8] sm:$0xff] }
 0x13a   :  { %v6631_v4 = vadd.f32 %v3708_v48, %v3673_v8  ;;  %2375 = vmatmul.mubr.f32.vlgmr.msra.gmra.mrb[14].mxu0 %v6498_v11  ;;  %v7560_v8 = vand.u32 4294901760, %v6294_v16  ;;  %v6657_v48 = vld [vmem:[#allocation5 + $0x390] sm:$0xff]  ;;  %v7561_v16 = vand.u32 4294901760, %v6300_v35  ;;  %v6678_v35 = vsub.f32 %v6629_v26, %v7350_v0 }
 0x13b   :  { %4994 = vmatpush3.bf16.msra.mxu0 %v4993_v42  ;;  %2649 = vmatprep.mubr.f32.mxu0 %v7558_v54  ;;  %v6648_v42 = vsub.f32 %v6611_v14, %v7353_v27  ;;  %v2815_v29 = vand.u32 4294901760, %v6657_v48  ;;  %v7568_v0 = vand.u32 4294901760, %v6374_v3  ;;  %v2767_v46 = vand.u32 4294901760, %v144_v36 }
 0x13c   :  { %4986 = vmatpush3.bf16.msra.mxu1 %v6525_v40  ;;  %4996 = vmatprep.subr.bf16.mxu0 %v4995_v18  ;;  %v4999_v20 = vpack.c.bf16 %v7560_v8, %v7559_v51  ;;  %v5001_v33 = vpack.c.bf16 %v7562_v57, %v7561_v16  ;;  %v6668_v18 = vsub.f32 %v6625_v32, %v7351_v30  ;;  %v7564_v51 = vand.u32 4294901760, %v6319_v43  ;;  %v145_v57 = vld [vmem:[#allocation5 + $0x318] sm:$0xff] }
 0x13d   :  { %4988 = vmatprep.subr.bf16.mxu1 %v6527_v62  ;;  %v2818_v16 = vand.u32 4294901760, %v6659_v52  ;;  %v7566_v43 = vand.u32 4294901760, %v6346_v45  ;;  %v7569_v27 = vand.u32 4294901760, %v6498_v11  ;;  %v7573_v45 = vand.u32 4294901760, %v7544_v5 }
 0x13e   :  { %v5003_v8 = vpack.c.bf16 %v7564_v51, %v7563_v38  ;;  %v7567_v51 = vand.u32 4294901760, %v6363_v47  ;;  %v7574_v47 = vand.u32 4294901760, %v6416_v28  ;;  %v7575_v3 = vand.u32 4294901760, %v6428_v34  ;;  %v45_v34 = vld [vmem:[#allocation2 + $0x38] sm:$0xff] }
 0x13f   :  { %4998 = vmatpush3.bf16.msra.mxu0 %v4997_v58  ;;  %v5005_v38 = vpack.c.bf16 %v7566_v43, %v7565_v24  ;;  %v7571_v58 = vand.u32 4294901760, %v6402_v9  ;;  %v5011_v24 = vpack.c.bf16 %v7573_v45, %v7572_v53  ;;  %v7363_v11 = vand.u32 4294901760, %v6668_v18 }
 0x140   :  { %4990 = vmatpush3.bf16.msra.mxu1 %v6550_v55  ;;  %5000 = vmatprep.subr.bf16.mxu0 %v4999_v20  ;;  %v5007_v30 = vpack.c.bf16 %v7568_v0, %v7567_v51  ;;  %v6707_v0 = vpack.c.bf16 %v7575_v3, %v7574_v47  ;;  %v2770_v9 = vand.u32 4294901760, %v145_v57  ;;  %v7576_v5 = vand.u32 4294901760, %v6648_v42 }
 0x141   :  { %5024 = vmatprep.subr.bf16.mxu1 %v6252_v2  ;;  %v7570_v2 = vand.u32 4294901760, %v6380_v21  ;;  %v6712_v21 = vsub.f32 %v6657_v48, %v2815_v29  ;;  %v7354_v28 = vand.u32 4294901760, %v6678_v35  ;;  %v6726_v48 = vsub.f32 %v6659_v52, %v2818_v16 }
 0x142   :  { %v7579_v43 = vand.u32 4294901760, %v6655_v12  ;;  %v7581_v53 = vand.u32 4294901760, %v6484_v39  ;;  %v7584_v52 = vand.u32 4294901760, %v6510_v17  ;;  %v6750_v3 = vsub.f32 %v144_v36, %v2767_v46 }
 0x143   :  { %2483 = vmatmul.mubr.f32.vlgmr.msra.gmra.mrb[14].mxu1 %v7569_v27  ;;  %5002 = vmatpush3.bf16.msra.mxu0 %v5001_v33  ;;  %v5009_v20 = vpack.c.bf16 %v7571_v58, %v7570_v2  ;;  %v162_v27 = vld [vmem:[#allocation5 + $0x3a0] sm:$0xff]  ;;  %v2988_v33 = vsub.f32 %v6648_v42, %v7576_v5  ;;  %v7577_v58 = vand.u32 4294901760, %v6448_v31  ;;  %v7580_v2 = vand.u32 4294901760, %v6481_v49  ;;  %v147_v49 = vld [vmem:[#allocation5 + $0x328] sm:$0xff] }
 0x144   :  { %5026 = vmatpush3.bf16.msra.mxu1 %v7539_v63  ;;  %5004 = vmatprep.subr.bf16.mxu0 %v5003_v8  ;;  %v7578_v63 = vand.u32 4294901760, %v6450_v6  ;;  %v2995_v51 = vsub.f32 %v6655_v12, %v7579_v43  ;;  %v7582_v31 = vand.u32 4294901760, %v6490_v23  ;;  %v7583_v6 = vand.u32 4294901760, %v6493_v13  ;;  %v146_v5 = vld [vmem:[#allocation5 + $0x320] sm:$0xff] }
 0x145   :  { %5028 = vmatprep.subr.bf16.mxu1 %v7540_v25  ;;  %2753 = vmatprep.mubr.f32.mxu1 %v7558_v54  ;;  %v6736_v25 = vpack.c.bf16 %v7581_v53, %v7580_v2  ;;  %v7585_v54 = vand.u32 4294901760, %v6513_v1  ;;  %v2821_v39 = vand.u32 4294901760, %v162_v27  ;;  %v2876_v23 = vsub.f32 %v6668_v18, %v7363_v11 }
 0x146   :  { %v6723_v8 = vpack.c.bf16 %v7578_v63, %v7577_v58  ;;  %v6742_v45 = vpack.c.bf16 %v7583_v6, %v7582_v31  ;;  %v2824_v58 = vand.u32 4294901760, %v163_v41  ;;  %v6755_v13 = vand.u32 4294901760, %v45_v34 }
 0x147   :  { %v6748_v47 = vpack.c.bf16 %v7585_v54, %v7584_v52  ;;  %5006 = vmatpush3.bf16.msra.mxu0 %v5005_v38  ;;  %v6758_v17 = vsub.f32 %v145_v57, %v2770_v9  ;;  %v2989_v1 = vand.u32 4294901760, %v2988_v33  ;;  %v2883_v36 = vsub.f32 %v6678_v35, %v7354_v28  ;;  %v164_v28 = vld [vmem:[#allocation5 + $0x3b0] sm:$0xff] }
 0x148   :  { %7586 = vst [vmem:[#allocation13_spill] sm:$0xff] %v6755_v13  ;;  %5030 = vmatpush3.bf16.msra.mxu1 %v7542_v50  ;;  %5008 = vmatprep.subr.bf16.mxu0 %v5007_v30  ;;  %v7358_v38 = vand.u32 4294901760, %v6712_v21  ;;  %v2996_v63 = vand.u32 4294901760, %v2995_v51  ;;  %v2773_v43 = vand.u32 4294901760, %v146_v5  ;;  %v2776_v2 = vand.u32 4294901760, %v147_v49 }
 0x149   :  { %5032 = vmatprep.subr.bf16.mxu1 %v7545_v7  ;;  %v7355_v53 = vand.u32 4294901760, %v6726_v48  ;;  %v7587_v31 = vand.u32 4294901760, %v6611_v14  ;;  %v7588_v50 = vand.u32 4294901760, %v6613_v10  ;;  %v7590_v57 = vand.u32 4294901760, %v6625_v32  ;;  %v165_v10 = vld [vmem:[#allocation5 + $0x3b8] sm:$0xff] }
 0x14a   :  { %v7591_v33 = vand.u32 4294901760, %v6629_v26  ;;  %v6778_v52 = vpack.c.bf16 %v2818_v16, %v2815_v29  ;;  %v6780_v7 = vpack.c.bf16 %v2770_v9, %v2767_v46  ;;  %v6782_v51 = vpack.c.bf16 %v2824_v58, %v2821_v39  ;;  %v148_v26 = vld [vmem:[#allocation5 + $0x330] sm:$0xff]  ;;  %v149_v29 = vld [vmem:[#allocation5 + $0x338] sm:$0xff] }
 0x14b   :  { %v6770_v30 = vpack.c.bf16 %v7588_v50, %v7587_v31  ;;  %5010 = vmatpush3.bf16.msra.mxu0 %v5009_v20  ;;  %v6784_v54 = vsub.f32 %v162_v27, %v2821_v39  ;;  %v2877_v14 = vand.u32 4294901760, %v2876_v23  ;;  %v6787_v31 = vsub.f32 %v45_v34, %v6755_v13 }
 0x14c   :  { %v6776_v6 = vpack.c.bf16 %v7591_v33, %v7590_v57  ;;  %7593 = vst [vmem:[#allocation21_spill] sm:$0xff] %v6778_v52  ;;  %7594 = vst [vmem:[#allocation19_spill] sm:$0xff] %v6782_v51  ;;  %5034 = vmatpush3.bf16.msra.mxu1 %v7546_v59  ;;  %5012 = vmatprep.subr.bf16.mxu0 %v5011_v24  ;;  %v2884_v32 = vand.u32 4294901760, %v2883_v36  ;;  %v3002_v46 = vsub.f32 %v6712_v21, %v7358_v38 }
 0x14d   :  { %7589 = vst [vmem:[#allocation11_spill] sm:$0xff] %v6770_v30  ;;  %v7357_v16 = vand.u32 4294901760, %v6750_v3  ;;  %v7356_v20 = vand.u32 4294901760, %v6758_v17  ;;  %v3741_v9 = vpop.f32.mrb[2].mxu0  ;;  %5036 = vmatprep.subr.bf16.mxu1 %v7547_v61  ;;  %v6796_v27 = vsub.f32 %v163_v41, %v2824_v58  ;;  %v6798_v34 = vpack.c.bf16 %v2996_v63, %v2989_v1  ;;  %v166_v58 = vld [vmem:[#allocation5 + $0x3c0] sm:$0xff]  ;;  %v167_v1 = vld [vmem:[#allocation5 + $0x3c8] sm:$0xff] }
 0x14e   :  { %7592 = vst [vmem:[#allocation16_spill] sm:$0xff] %v6776_v6  ;;  %v6800_v59 = vpack.c.bf16 %v2776_v2, %v2773_v43  ;;  %v3009_v24 = vsub.f32 %v6726_v48, %v7355_v53  ;;  %v3742_v39 = vpop.f32.mrb[3].mxu0  ;;  %v6805_v23 = vsub.f32 %v146_v5, %v2773_v43  ;;  %v6807_v36 = vsub.f32 %v147_v49, %v2776_v2 }
 0x14f   :  { %v2827_v50 = vand.u32 4294901760, %v164_v28  ;;  %v2830_v57 = vand.u32 4294901760, %v165_v10  ;;  %v3743_v33 = vadd.f32 %v3742_v39, %v3741_v9  ;;  %5014 = vmatpush3.bf16.msra.mxu0 %v6707_v0  ;;  %v2779_v61 = vand.u32 4294901760, %v148_v26 }
 0x150   :  { %7595 = vst [vmem:[#allocation20_spill] sm:$0xff] %v6800_v59  ;;  %v2782_v41 = vand.u32 4294901760, %v149_v29  ;;  %v7364_v63 = vand.u32 4294901760, %v6787_v31  ;;  %5038 = vmatpush3.bf16.msra.mxu1 %v7548_v37  ;;  %5016 = vmatprep.subr.bf16.mxu0 %v6723_v8  ;;  %v6813_v53 = vpack.c.bf16 %v2884_v32, %v2877_v14  ;;  %v3003_v5 = vand.u32 4294901760, %v3002_v46 }
 0x151   :  { %v2890_v49 = vsub.f32 %v6750_v3, %v7357_v16  ;;  %v2897_v0 = vsub.f32 %v6758_v17, %v7356_v20  ;;  %v653_v43 = vadd.f32 %v3743_v33, %v6631_v4  ;;  %5040 = vmatprep.subr.bf16.mxu1 %v7549_v19  ;;  %v3010_v2 = vand.u32 4294901760, %v3009_v24  ;;  %v6833_v4 = vld [vmem:[#allocation5 + $0x340] sm:$0xff] }
 0x152   :  { %v7361_v37 = vand.u32 4294901760, %v6784_v54  ;;  %v7359_v8 = vand.u32 4294901760, %v6796_v27  ;;  %v6825_v14 = vpack.c.bf16 %v2830_v57, %v2827_v50  ;;  %v2833_v32 = vand.u32 4294901760, %v166_v58 }
 0x153   :  { %v2836_v46 = vand.u32 4294901760, %v167_v1  ;;  %v7360_v9 = vand.u32 4294901760, %v6805_v23  ;;  %5018 = vmatpush3.bf16.msra.mxu0 %v6736_v25  ;;  %v6829_v39 = vsub.f32 %v164_v28, %v2827_v50  ;;  %v6831_v20 = vsub.f32 %v165_v10, %v2830_v57 }
 0x154   :  { %7596 = vst [vmem:[#allocation22_spill] sm:$0xff] %v6825_v14  ;;  %v7362_v19 = vand.u32 4294901760, %v6807_v36  ;;  %v2859_v24 = vsub.f32 %v6787_v31, %v7364_v63  ;;  %5042 = vmatpush3.bf16.msra.mxu1 %v6390_v60  ;;  %5020 = vmatprep.subr.bf16.mxu0 %v6742_v45  ;;  %v6841_v33 = vpack.c.bf16 %v2782_v41, %v2779_v61  ;;  %v2891_v25 = vand.u32 4294901760, %v2890_v49  ;;  %v168_v49 = vld [vmem:[#allocation5 + $0x3d0] sm:$0xff] }
 0x155   :  { %v6843_v16 = vsub.f32 %v148_v26, %v2779_v61  ;;  %v6845_v28 = vsub.f32 %v149_v29, %v2782_v41  ;;  %5044 = vmatprep.subr.bf16.mxu1 %v6404_v44  ;;  %v6848_v10 = vpack.c.bf16 %v3010_v2, %v3003_v5  ;;  %v2898_v50 = vand.u32 4294901760, %v2897_v0  ;;  %v151_v29 = vld [vmem:[#allocation5 + $0x348] sm:$0xff]  ;;  %v169_v0 = vld [vmem:[#allocation5 + $0x3d8] sm:$0xff] }
 0x156   :  { %7597 = vst [vmem:[#allocation14_spill] sm:$0xff] %v6841_v33  ;;  %v3016_v57 = vsub.f32 %v6784_v54, %v7361_v37  ;;  %v3023_v60 = vsub.f32 %v6796_v27, %v7359_v8  ;;  %v3776_v45 = vpop.f32.mrb[2].mxu1  ;;  %v6856_v38 = vpack.c.bf16 %v2836_v46, %v2833_v32  ;;  %v6858_v26 = vsub.f32 %v166_v58, %v2833_v32  ;;  %v152_v58 = vld [vmem:[#allocation5 + $0x350] sm:$0xff] }
 0x157   :  { %7598 = vst [vmem:[#allocation15_spill] sm:$0xff] %v6843_v16  ;;  %7599 = vst [vmem:[#allocation17_spill] sm:$0xff] %v6845_v28  ;;  %v2785_v61 = vand.u32 4294901760, %v6833_v4  ;;  %v2904_v44 = vsub.f32 %v6805_v23, %v7360_v9  ;;  %v3777_v41 = vpop.f32.mrb[3].mxu1  ;;  %5022 = vmatpush3.bf16.msra.mxu0 %v6748_v47  ;;  %v2911_v5 = vsub.f32 %v6807_v36, %v7362_v19  ;;  %v2860_v32 = vand.u32 4294901760, %v2859_v24  ;;  %v153_v24 = vld [vmem:[#allocation5 + $0x358] sm:$0xff] }
 0x158   :  { %7600 = vst [vmem:[#allocation18_spill] sm:$0xff] %v6856_v38  ;;  %v3778_v8 = vadd.f32 %v3777_v41, %v3776_v45  ;;  %5046 = vmatpush3.bf16.msra.mxu1 %v6421_v56  ;;  %5056 = vmatprep.subr.bf16.mxu0 %v6770_v30  ;;  %v6872_v9 = vsub.f32 %v167_v1, %v2836_v46  ;;  %v7371_v47 = vand.u32 4294901760, %v6843_v16  ;;  %v7374_v37 = vand.u32 4294901760, %v6845_v28 }
 0x159   :  { %5048 = vmatprep.subr.bf16.mxu1 %v6446_v22  ;;  %v6877_v19 = vpack.c.bf16 %v2898_v50, %v2891_v25  ;;  %v3017_v11 = vand.u32 4294901760, %v3016_v57  ;;  %v3024_v63 = vand.u32 4294901760, %v3023_v60  ;;  %v2788_v2 = vand.u32 4294901760, %v151_v29 }
 0x15a   :  { %v6879_v45 = vadd.f32 %v3778_v8, %v653_v43  ;;  %2651 = vmatmul.mubr.f32.vlgmr.msra.gmra.mrb[16].mxu0 %v6467_v15  ;;  %v6883_v56 = vsub.f32 %v6833_v4, %v2785_v61  ;;  %v2839_v1 = vand.u32 4294901760, %v168_v49  ;;  %v2842_v46 = vand.u32 4294901760, %v169_v0  ;;  %v170_v8 = vld [vmem:[#allocation5 + $0x3e0] sm:$0xff] }
 0x15b   :  { %5058 = vmatpush3.bf16.msra.mxu0 %v6776_v6  ;;  %v2905_v41 = vand.u32 4294901760, %v2904_v44  ;;  %v2912_v22 = vand.u32 4294901760, %v2911_v5  ;;  %v7601_v25 = vand.u32 4294901760, %v6829_v39  ;;  %v7602_v57 = vand.u32 4294901760, %v6831_v20  ;;  %2861 = vmatprep.mubr.f32.mxu0 %v2860_v32 }
 0x15c   :  { %5050 = vmatpush3.bf16.msra.mxu1 %v6525_v40  ;;  %5060 = vmatprep.subr.bf16.mxu0 %v6778_v52  ;;  %v2791_v4 = vand.u32 4294901760, %v152_v58  ;;  %v2794_v60 = vand.u32 4294901760, %v153_v24  ;;  %v2918_v44 = vsub.f32 %v6843_v16, %v7371_v47  ;;  %v2925_v5 = vsub.f32 %v6845_v28, %v7374_v37 }
 0x15d   :  { %v3030_v50 = vsub.f32 %v6829_v39, %v7601_v25  ;;  %v3037_v43 = vsub.f32 %v6831_v20, %v7602_v57  ;;  %v171_v25 = vld [vmem:[#allocation5 + $0x3e8] sm:$0xff]  ;;  %5052 = vmatprep.subr.bf16.mxu1 %v6527_v62  ;;  %v6901_v57 = vpack.c.bf16 %v3024_v63, %v3017_v11  ;;  %v6903_v32 = vpack.c.bf16 %v2788_v2, %v2785_v61 }
 0x15e   :  { %v6905_v40 = vsub.f32 %v151_v29, %v2788_v2  ;;  %v7377_v52 = vand.u32 4294901760, %v6858_v26  ;;  %v6908_v6 = vpack.c.bf16 %v2842_v46, %v2839_v1  ;;  %v6910_v30 = vsub.f32 %v168_v49, %v2839_v1 }
 0x15f   :  { %7603 = vst [vmem:[#allocation12_spill] sm:$0xff] %v6903_v32  ;;  %v6912_v47 = vsub.f32 %v169_v0, %v2842_v46  ;;  %v2845_v16 = vand.u32 4294901760, %v170_v8  ;;  %5062 = vmatpush3.bf16.msra.mxu0 %v6780_v7  ;;  %v3031_v37 = vand.u32 4294901760, %v3030_v50  ;;  %v3038_v28 = vand.u32 4294901760, %v3037_v43  ;;  %v155_v46 = vld [vmem:[#allocation5 + $0x368] sm:$0xff]  ;;  %v6936_v43 = vld [vmem:[#allocation5 + $0x3f0] sm:$0xff] }
 0x160   :  { %7604 = vst [vmem:[#allocation23_spill] sm:$0xff] %v6908_v6  ;;  %v2848_v62 = vand.u32 4294901760, %v171_v25  ;;  %v7378_v11 = vand.u32 4294901760, %v6872_v9  ;;  %5054 = vmatpush3.bf16.msra.mxu1 %v6550_v55  ;;  %5064 = vmatprep.subr.bf16.mxu0 %v6782_v51  ;;  %v6918_v63 = vpack.c.bf16 %v2912_v22, %v2905_v41  ;;  %v6920_v29 = vpack.c.bf16 %v2794_v60, %v2791_v4  ;;  %v154_v55 = vld [vmem:[#allocation5 + $0x360] sm:$0xff] }
 0x161   :  { %v2919_v61 = vand.u32 4294901760, %v2918_v44  ;;  %v2926_v49 = vand.u32 4294901760, %v2925_v5  ;;  %5088 = vmatprep.subr.bf16.mxu1 %v6798_v34  ;;  %v6923_v0 = vsub.f32 %v152_v58, %v2791_v4  ;;  %v6925_v2 = vsub.f32 %v153_v24, %v2794_v60  ;;  %v6938_v34 = vld [vmem:[#allocation5 + $0x3f8] sm:$0xff]  ;;  %v44_v44 = vld [vmem:[#allocation2 + $0x30] sm:$0xff] }
 0x162   :  { %v6930_v1 = vsub.f32 %v6858_v26, %v7377_v52  ;;  %v7379_v41 = vand.u32 4294901760, %v6883_v56  ;;  %v6933_v22 = vsub.f32 %v170_v8, %v2845_v16  ;;  %v7386_v50 = vand.u32 4294901760, %v6905_v40 }
 0x163   :  { %7605 = vst [vmem:[#allocation24_spill] sm:$0xff] %v6925_v2  ;;  %2755 = vmatmul.mubr.f32.vlgmr.msra.gmra.mrb[16].mxu1 %v6467_v15  ;;  %5066 = vmatpush3.bf16.msra.mxu0 %v6800_v59  ;;  %v5099_v4 = vpack.c.bf16 %v3038_v28, %v3031_v37  ;;  %v6944_v60 = vpack.c.bf16 %v2848_v62, %v2845_v16  ;;  %v2797_v24 = vand.u32 4294901760, %v154_v55  ;;  %v2800_v58 = vand.u32 4294901760, %v155_v46 }
 0x164   :  { %7606 = vst [vmem:[#allocation25_spill] sm:$0xff] %v6933_v22  ;;  %v3051_v8 = vsub.f32 %v6872_v9, %v7378_v11  ;;  %5090 = vmatpush3.bf16.msra.mxu1 %v6813_v53  ;;  %5068 = vmatprep.subr.bf16.mxu0 %v6825_v14  ;;  %v5101_v5 = vpack.c.bf16 %v2926_v49, %v2919_v61  ;;  %v3045_v15 = vand.u32 4294901760, %v6930_v1  ;;  %v2851_v37 = vand.u32 4294901760, %v6936_v43  ;;  %v6960_v53 = vld [vmem:[#allocation5 + $0x370] sm:$0xff]  ;;  %v6962_v11 = vld [vmem:[#allocation5 + $0x378] sm:$0xff] }
 0x165   :  { %v6951_v52 = vsub.f32 %v171_v25, %v2848_v62  ;;  %5092 = vmatprep.subr.bf16.mxu1 %v6848_v10  ;;  %v2932_v16 = vsub.f32 %v6883_v56, %v7379_v41  ;;  %v2854_v28 = vand.u32 4294901760, %v6938_v34  ;;  %3097 = vmatprep.mubr.f32.mxu1 %v6755_v13  ;;  %v2939_v10 = vsub.f32 %v6905_v40, %v7386_v50 }
 0x166   :  { %v7607_v25 = vand.u32 4294901760, %v6910_v30  ;;  %v7608_v61 = vand.u32 4294901760, %v6912_v47  ;;  %v6974_v1 = vand.u32 4294901760, %v44_v44  ;;  %v3052_v41 = vand.u32 4294901760, %v3051_v8 }
 0x167   :  { %5070 = vmatpush3.bf16.msra.mxu0 %v6841_v33  ;;  %v6984_v50 = vsub.f32 %v155_v46, %v2800_v58  ;;  %v2806_v51 = vand.u32 4294901760, %v6962_v11  ;;  %v2933_v8 = vand.u32 4294901760, %v2932_v16  ;;  %v6990_v14 = vsub.f32 %v6936_v43, %v2851_v37 }
 0x168   :  { %v3058_v62 = vsub.f32 %v6910_v30, %v7607_v25  ;;  %v3065_v49 = vsub.f32 %v6912_v47, %v7608_v61  ;;  %5094 = vmatpush3.bf16.msra.mxu1 %v6877_v19  ;;  %5072 = vmatprep.subr.bf16.mxu0 %v6856_v38  ;;  %v6982_v25 = vsub.f32 %v154_v55, %v2797_v24  ;;  %v2803_v61 = vand.u32 4294901760, %v6960_v53 }
 0x169   :  { %5096 = vmatprep.subr.bf16.mxu1 %v6901_v57  ;;  %v6993_v59 = vsub.f32 %v6938_v34, %v2854_v28  ;;  %v2940_v13 = vand.u32 4294901760, %v2939_v10  ;;  %v6997_v46 = vsub.f32 %v44_v44, %v6974_v1  ;;  %v7000_v33 = vpack.c.bf16 %v2800_v58, %v2797_v24 }
 0x16a   :  { %v3059_v55 = vand.u32 4294901760, %v3058_v62  ;;  %v3066_v38 = vand.u32 4294901760, %v3065_v49  ;;  %v7609_v57 = vand.u32 4294901760, %v6923_v0  ;;  %v7610_v16 = vand.u32 4294901760, %v6925_v2 }
 0x16b   :  { %5074 = vmatpush3.bf16.msra.mxu0 %v6903_v32  ;;  %v7611_v19 = vand.u32 4294901760, %v6933_v22  ;;  %v7014_v44 = vsub.f32 %v6960_v53, %v2803_v61  ;;  %v7017_v58 = vsub.f32 %v6962_v11, %v2806_v51  ;;  %v2966_v62 = vand.u32 4294901760, %v6984_v50 }
 0x16c   :  { %v2946_v43 = vsub.f32 %v6923_v0, %v7609_v57  ;;  %v2953_v34 = vsub.f32 %v6925_v2, %v7610_v16  ;;  %5098 = vmatpush3.bf16.msra.mxu1 %v6918_v63  ;;  %5076 = vmatprep.subr.bf16.mxu0 %v6908_v6  ;;  %v5103_v57 = vpack.c.bf16 %v3052_v41, %v3045_v15  ;;  %v7612_v16 = vand.u32 4294901760, %v6951_v52 }
 0x16d   :  { %v3072_v10 = vsub.f32 %v6933_v22, %v7611_v19  ;;  %v3811_v49 = vpop.f32.mrb[4].mxu0  ;;  %5100 = vmatprep.subr.bf16.mxu1 %v5099_v4  ;;  %v7403_v63 = vand.u32 4294901760, %v6990_v14  ;;  %v5105_v32 = vpack.c.bf16 %v2940_v13, %v2933_v8  ;;  %v7026_v22 = vpack.c.bf16 %v2854_v28, %v2851_v37 }
 0x16e   :  { %v3079_v19 = vsub.f32 %v6951_v52, %v7612_v16  ;;  %v3812_v53 = vpop.f32.mrb[5].mxu0  ;;  %v5107_v11 = vpack.c.bf16 %v3066_v38, %v3059_v55  ;;  %v2864_v24 = vand.u32 4294901760, %v6997_v46  ;;  %v2947_v4 = vand.u32 4294901760, %v2946_v43 }
 0x16f   :  { %v3813_v2 = vadd.f32 %v3812_v53, %v3811_v49  ;;  %5078 = vmatpush3.bf16.msra.mxu0 %v6920_v29  ;;  %v2954_v41 = vand.u32 4294901760, %v2953_v34  ;;  %v3073_v15 = vand.u32 4294901760, %v3072_v10  ;;  %v7613_v16 = vand.u32 4294901760, %v6982_v25 }
 0x170   :  { %5102 = vmatpush3.bf16.msra.mxu1 %v5101_v5  ;;  %5080 = vmatprep.subr.bf16.mxu0 %v6944_v60  ;;  %v2967_v13 = vsub.f32 %v6984_v50, %v2966_v62  ;;  %v7401_v38 = vand.u32 4294901760, %v7014_v44  ;;  %v7402_v37 = vand.u32 4294901760, %v7017_v58  ;;  %v3080_v8 = vand.u32 4294901760, %v3079_v19 }
 0x171   :  { %v2960_v6 = vsub.f32 %v6982_v25, %v7613_v16  ;;  %v929_v28 = vadd.f32 %v3813_v2, %v6879_v45  ;;  %5104 = vmatprep.subr.bf16.mxu1 %v5103_v57  ;;  %v3086_v5 = vsub.f32 %v6990_v14, %v7403_v63  ;;  %v7614_v55 = vand.u32 4294901760, %v6993_v59 }
 0x172   :  { %v2865_v34 = vsub.f32 %v6997_v46, %v2864_v24  ;;  %v7050_v10 = vpack.c.bf16 %v2806_v51, %v2803_v61  ;;  %v5109_v49 = vpack.c.bf16 %v2954_v41, %v2947_v4  ;;  %v5119_v45 = vpack.c.bf16 %v6655_v12, %v6648_v42 }
 0x173   :  { %v3093_v43 = vsub.f32 %v6993_v59, %v7614_v55  ;;  %5082 = vmatpush3.bf16.msra.mxu0 %v7000_v33  ;;  %v2961_v2 = vand.u32 4294901760, %v2960_v6  ;;  %v2968_v57 = vand.u32 4294901760, %v2967_v13  ;;  %v2974_v19 = vsub.f32 %v7014_v44, %v7401_v38 }
 0x174   :  { %5106 = vmatpush3.bf16.msra.mxu1 %v5105_v32  ;;  %5084 = vmatprep.subr.bf16.mxu0 %v7026_v22  ;;  %v2981_v53 = vsub.f32 %v7017_v58, %v7402_v37  ;;  %v5111_v51 = vpack.c.bf16 %v3080_v8, %v3073_v15  ;;  %v3087_v61 = vand.u32 4294901760, %v3086_v5  ;;  %v2866_v16 = vand.u32 4294901760, %v2865_v34 }
 0x175   :  { %5108 = vmatprep.subr.bf16.mxu1 %v5107_v11  ;;  %v3094_v4 = vand.u32 4294901760, %v3093_v43  ;;  %v5121_v6 = vpack.c.bf16 %v6678_v35, %v6668_v18  ;;  %v5123_v32 = vpack.c.bf16 %v6726_v48, %v6712_v21  ;;  %v5113_v38 = vpack.c.bf16 %v2968_v57, %v2961_v2  ;;  %v7618_v57 = vld [vmem:[#allocation16_spill] sm:$0xff] }
 0x176   :  { %v3846_v41 = vpop.f32.mrb[4].mxu1  ;;  %v2975_v37 = vand.u32 4294901760, %v2974_v19  ;;  %v2982_v11 = vand.u32 4294901760, %v2981_v53  ;;  %v5125_v5 = vpack.c.bf16 %v6758_v17, %v6750_v3  ;;  %v5127_v34 = vpack.c.bf16 %v6796_v27, %v6784_v54  ;;  %v7619_v53 = vld [vmem:[#allocation21_spill] sm:$0xff] }
 0x177   :  { %v3847_v55 = vpop.f32.mrb[5].mxu1  ;;  %5086 = vmatpush3.bf16.msra.mxu0 %v7050_v10  ;;  %v5115_v15 = vpack.c.bf16 %v3094_v4, %v3087_v61  ;;  %v5135_v19 = vpack.c.bf16 %v6872_v9, %v6858_v26  ;;  %v5137_v61 = vpack.c.bf16 %v6905_v40, %v6883_v56  ;;  %v5139_v4 = vpack.c.bf16 %v6912_v47, %v6910_v30 }
 0x178   :  { %v3848_v13 = vadd.f32 %v3847_v55, %v3846_v41  ;;  %5110 = vmatpush3.bf16.msra.mxu1 %v5109_v49  ;;  %5120 = vmatprep.subr.bf16.mxu0 %v5119_v45  ;;  %v5117_v43 = vpack.c.bf16 %v2982_v11, %v2975_v37  ;;  %v5129_v49 = vpack.c.bf16 %v6807_v36, %v6805_v23  ;;  %v7615_v45 = vld [vmem:[#allocation11_spill] sm:$0xff]  ;;  %v7617_v37 = vld [vmem:[#allocation17_spill] sm:$0xff]  ;;  %v7625_v11 = vld [vmem:[#allocation22_spill] sm:$0xff] }
 0x179   :  { %5112 = vmatprep.subr.bf16.mxu1 %v5111_v51  ;;  %v7620_v51 = vand.u32 4294901760, %v6787_v31  ;;  %v7621_v41 = vld [vmem:[#allocation19_spill] sm:$0xff] }
 0x17a   :  { %v1033_v8 = vadd.f32 %v3848_v13, %v929_v28  ;;  %2867 = vmatmul.mubr.f32.vlgmr.msra.gmra.mrb[18].mxu0 %v2866_v16  ;;  %v5131_v28 = vpack.c.bf16 %v6831_v20, %v6829_v39  ;;  %v7622_v16 = vld [vmem:[#allocation24_spill] sm:$0xff] }
 0x17b   :  { %5122 = vmatpush3.bf16.msra.mxu0 %v5121_v6  ;;  %3234 = vmatprep.mubr.f32.mxu0 %v6787_v31  ;;  %v5141_v55 = vpack.c.bf16 %v7622_v16, %v6923_v0  ;;  %v7623_v6 = vld [vmem:[#allocation20_spill] sm:$0xff]  ;;  %v7624_v31 = vld [vmem:[#allocation25_spill] sm:$0xff] }
 0x17c   :  { %5114 = vmatpush3.bf16.msra.mxu1 %v5113_v38  ;;  %5124 = vmatprep.subr.bf16.mxu0 %v5123_v32  ;;  %v7616_v38 = vld [vmem:[#allocation15_spill] sm:$0xff]  ;;  %v5143_v32 = vpack.c.bf16 %v6951_v52, %v7624_v31 }
 0x17d   :  { %5116 = vmatprep.subr.bf16.mxu1 %v5115_v15  ;;  %v5133_v2 = vpack.c.bf16 %v7617_v37, %v7616_v38 }
 0x17f   :  { %5126 = vmatpush3.bf16.msra.mxu0 %v5125_v5 }
 0x180   :  { %5118 = vmatpush3.bf16.msra.mxu1 %v5117_v43  ;;  %5128 = vmatprep.subr.bf16.mxu0 %v5127_v34  ;;  %v5145_v43 = vpack.c.bf16 %v6984_v50, %v6982_v25  ;;  %v7626_v34 = vld [vmem:[#allocation14_spill] sm:$0xff] }
 0x181   :  { %5152 = vmatprep.subr.bf16.mxu1 %v7615_v45 }
 0x183   :  { %3099 = vmatmul.mubr.f32.vlgmr.msra.gmra.mrb[18].mxu1 %v6974_v1  ;;  %5130 = vmatpush3.bf16.msra.mxu0 %v5129_v49  ;;  %v5147_v49 = vpack.c.bf16 %v6993_v59, %v6990_v14 }
 0x184   :  { %5154 = vmatpush3.bf16.msra.mxu1 %v7618_v57  ;;  %5132 = vmatprep.subr.bf16.mxu0 %v5131_v28 }
 0x185   :  { %5156 = vmatprep.subr.bf16.mxu1 %v7619_v53  ;;  %3341 = vmatprep.mubr.f32.mxu1 %v7620_v51  ;;  %v7628_v51 = vld [vmem:[#allocation12_spill] sm:$0xff] }
 0x187   :  { %5134 = vmatpush3.bf16.msra.mxu0 %v5133_v2  ;;  %v7627_v2 = vld [vmem:[#allocation18_spill] sm:$0xff] }
 0x188   :  { %5158 = vmatpush3.bf16.msra.mxu1 %v6780_v7  ;;  %5136 = vmatprep.subr.bf16.mxu0 %v5135_v19  ;;  %v5149_v19 = vpack.c.bf16 %v7017_v58, %v7014_v44 }
 0x189   :  { %5160 = vmatprep.subr.bf16.mxu1 %v7621_v41 }
 0x18b   :  { %5138 = vmatpush3.bf16.msra.mxu0 %v5137_v61  ;;  %v7629_v61 = vand.u32 4294901760, %v6648_v42  ;;  %v7635_v42 = vand.u32 4294901760, %v6726_v48  ;;  %v7640_v48 = vand.u32 4294901760, %v6796_v27  ;;  %v7646_v27 = vand.u32 4294901760, %v7617_v37 }
 0x18c   :  { %5162 = vmatpush3.bf16.msra.mxu1 %v7623_v6  ;;  %5140 = vmatprep.subr.bf16.mxu0 %v5139_v4  ;;  %v7630_v4 = vand.u32 4294901760, %v6655_v12 }
 0x18d   :  { %v3881_v13 = vpop.f32.mrb[6].mxu0  ;;  %5164 = vmatprep.subr.bf16.mxu1 %v7625_v11 }
 0x18e   :  { %v3882_v15 = vpop.f32.mrb[7].mxu0 }
 0x18f   :  { %v3883_v5 = vadd.f32 %v3882_v15, %v3881_v13  ;;  %5142 = vmatpush3.bf16.msra.mxu0 %v5141_v55  ;;  %v5183_v55 = vpack.c.bf16 %v7630_v4, %v7629_v61  ;;  %v7631_v13 = vld [vmem:[#allocation23_spill] sm:$0xff]  ;;  %v7638_v4 = vld [vmem:[#allocation13_spill] sm:$0xff] }
 0x190   :  { %5166 = vmatpush3.bf16.msra.mxu1 %v7626_v34  ;;  %5144 = vmatprep.subr.bf16.mxu0 %v5143_v32 }
 0x191   :  { %v1145_v28 = vadd.f32 %v3883_v5, %v1033_v8  ;;  %5168 = vmatprep.subr.bf16.mxu1 %v7627_v2  ;;  %v7632_v8 = vand.u32 4294901760, %v6668_v18  ;;  %v7633_v5 = vand.u32 4294901760, %v6678_v35  ;;  %v7636_v18 = vand.u32 4294901760, %v6750_v3 }
 0x192   :  { %v7637_v35 = vand.u32 4294901760, %v6758_v17  ;;  %v7642_v3 = vand.u32 4294901760, %v6807_v36  ;;  %v7643_v17 = vand.u32 4294901760, %v6829_v39  ;;  %v7647_v36 = vand.u32 4294901760, %v6858_v26 }
 0x193   :  { %5146 = vmatpush3.bf16.msra.mxu0 %v5145_v43  ;;  %v5185_v43 = vpack.c.bf16 %v7633_v5, %v7632_v8  ;;  %v7648_v39 = vand.u32 4294901760, %v6872_v9  ;;  %v7652_v26 = vand.u32 4294901760, %v6912_v47  ;;  %v7653_v9 = vand.u32 4294901760, %v6923_v0 }
 0x194   :  { %5170 = vmatpush3.bf16.msra.mxu1 %v7628_v51  ;;  %5148 = vmatprep.subr.bf16.mxu0 %v5147_v49  ;;  %v7634_v49 = vand.u32 4294901760, %v6712_v21  ;;  %v7639_v21 = vand.u32 4294901760, %v6784_v54  ;;  %v7645_v54 = vand.u32 4294901760, %v7616_v38  ;;  %v7651_v38 = vand.u32 4294901760, %v6910_v30 }
 0x195   :  { %5172 = vmatprep.subr.bf16.mxu1 %v7631_v13  ;;  %v7661_v5 = vand.u32 4294901760, %v7017_v58 }
 0x196   :  { %v3916_v32 = vpop.f32.mrb[6].mxu1  ;;  %v5187_v12 = vpack.c.bf16 %v7635_v42, %v7634_v49  ;;  %v5203_v37 = vpack.c.bf16 %v7652_v26, %v7651_v38 }
 0x197   :  { %v3917_v15 = vpop.f32.mrb[7].mxu1  ;;  %5150 = vmatpush3.bf16.msra.mxu0 %v5149_v19  ;;  %v5189_v19 = vpack.c.bf16 %v7637_v35, %v7636_v18 }
 0x198   :  { %v3918_v63 = vadd.f32 %v3917_v15, %v3916_v32  ;;  %5174 = vmatpush3.bf16.msra.mxu1 %v6920_v29  ;;  %5184 = vmatprep.subr.bf16.mxu0 %v5183_v55  ;;  %v5191_v55 = vpack.c.bf16 %v7640_v48, %v7639_v21  ;;  %v7644_v32 = vand.u32 4294901760, %v6831_v20  ;;  %v5199_v20 = vpack.c.bf16 %v7648_v39, %v7647_v36 }
 0x199   :  { %5176 = vmatprep.subr.bf16.mxu1 %v6944_v60 }
 0x19a   :  { %v1377_v61 = vadd.f32 %v3918_v63, %v1145_v28  ;;  %3237 = vmatmul.mubr.f32.vlgmr.msra.gmra.mrb[20].mxu0 %v6997_v46  ;;  %v7641_v63 = vand.u32 4294901760, %v6805_v23  ;;  %v5195_v15 = vpack.c.bf16 %v7644_v32, %v7643_v17  ;;  %v5197_v23 = vpack.c.bf16 %v7646_v27, %v7645_v54 }
 0x19b   :  { %5186 = vmatpush3.bf16.msra.mxu0 %v5185_v43  ;;  %3511 = vmatprep.mubr.f32.mxu0 %v7638_v4  ;;  %v7649_v46 = vand.u32 4294901760, %v6883_v56  ;;  %v7655_v56 = vand.u32 4294901760, %v7624_v31 }
 0x19c   :  { %5178 = vmatpush3.bf16.msra.mxu1 %v7000_v33  ;;  %5188 = vmatprep.subr.bf16.mxu0 %v5187_v12  ;;  %v5193_v28 = vpack.c.bf16 %v7642_v3, %v7641_v63 }
 0x19d   :  { %5180 = vmatprep.subr.bf16.mxu1 %v7026_v22 }
 0x19f   :  { %5190 = vmatpush3.bf16.msra.mxu0 %v5189_v19 }
 0x1a0   :  { %5182 = vmatpush3.bf16.msra.mxu1 %v7050_v10  ;;  %5192 = vmatprep.subr.bf16.mxu0 %v5191_v55 }
 0x1a1   :  { %5216 = vmatprep.subr.bf16.mxu1 %v7615_v45 }
 0x1a3   :  { %3345 = vmatmul.mubr.f32.vlgmr.msra.gmra.mrb[20].mxu1 %v2864_v24  ;;  %5194 = vmatpush3.bf16.msra.mxu0 %v5193_v28  ;;  %v7650_v24 = vand.u32 4294901760, %v6905_v40 }
 0x1a4   :  { %5218 = vmatpush3.bf16.msra.mxu1 %v7618_v57  ;;  %5196 = vmatprep.subr.bf16.mxu0 %v5195_v15  ;;  %v7654_v57 = vand.u32 4294901760, %v7622_v16  ;;  %v7658_v16 = vand.u32 4294901760, %v6990_v14 }
 0x1a5   :  { %5220 = vmatprep.subr.bf16.mxu1 %v7619_v53  ;;  %3615 = vmatprep.mubr.f32.mxu1 %v7638_v4  ;;  %v5201_v45 = vpack.c.bf16 %v7650_v24, %v7649_v46 }
 0x1a6   :  { %v5205_v53 = vpack.c.bf16 %v7654_v57, %v7653_v9 }
 0x1a7   :  { %5198 = vmatpush3.bf16.msra.mxu0 %v5197_v23 }
 0x1a8   :  { %5222 = vmatpush3.bf16.msra.mxu1 %v6780_v7  ;;  %5200 = vmatprep.subr.bf16.mxu0 %v5199_v20  ;;  %v7656_v7 = vand.u32 4294901760, %v6951_v52 }
 0x1a9   :  { %5224 = vmatprep.subr.bf16.mxu1 %v7621_v41  ;;  %v7657_v41 = vand.u32 4294901760, %v6982_v25 }
 0x1aa   :  { %v5207_v40 = vpack.c.bf16 %v7656_v7, %v7655_v56 }
 0x1ab   :  { %5202 = vmatpush3.bf16.msra.mxu0 %v5201_v45  ;;  %v5209_v0 = vpack.c.bf16 %v2966_v62, %v7657_v41 }
 0x1ac   :  { %5226 = vmatpush3.bf16.msra.mxu1 %v7623_v6  ;;  %5204 = vmatprep.subr.bf16.mxu0 %v5203_v37  ;;  %v7659_v6 = vand.u32 4294901760, %v6993_v59 }
 0x1ad   :  { %v3951_v30 = vpop.f32.mrb[8].mxu0  ;;  %5228 = vmatprep.subr.bf16.mxu1 %v7625_v11  ;;  %v7660_v11 = vand.u32 4294901760, %v7014_v44 }
 0x1ae   :  { %v3952_v47 = vpop.f32.mrb[9].mxu0  ;;  %v5211_v52 = vpack.c.bf16 %v7659_v6, %v7658_v16 }
 0x1af   :  { %v3953_v8 = vadd.f32 %v3952_v47, %v3951_v30  ;;  %5206 = vmatpush3.bf16.msra.mxu0 %v5205_v53  ;;  %v5213_v25 = vpack.c.bf16 %v7661_v5, %v7660_v11 }
 0x1b0   :  { %5230 = vmatpush3.bf16.msra.mxu1 %v7626_v34  ;;  %5208 = vmatprep.subr.bf16.mxu0 %v5207_v40 }
 0x1b1   :  { %v1515_v31 = vadd.f32 %v3953_v8, %v1377_v61  ;;  %5232 = vmatprep.subr.bf16.mxu1 %v7627_v2 }
 0x1b3   :  { %5210 = vmatpush3.bf16.msra.mxu0 %v5209_v0 }
 0x1b4   :  { %5234 = vmatpush3.bf16.msra.mxu1 %v7628_v51  ;;  %5212 = vmatprep.subr.bf16.mxu0 %v5211_v52 }
 0x1b5   :  { %5236 = vmatprep.subr.bf16.mxu1 %v7631_v13 }
 0x1b6   :  { %v3986_v50 = vpop.f32.mrb[8].mxu1 }
 0x1b7   :  { %v3987_v62 = vpop.f32.mrb[9].mxu1  ;;  %5214 = vmatpush3.bf16.msra.mxu0 %v5213_v25 }
 0x1b8   :  { %v3988_v14 = vadd.f32 %v3987_v62, %v3986_v50  ;;  %5238 = vmatpush3.bf16.msra.mxu1 %v6920_v29 }
 0x1b9   :  { %5240 = vmatprep.subr.bf16.mxu1 %v6944_v60 }
 0x1ba   :  { %v1623_v59 = vadd.f32 %v3988_v14, %v1515_v31  ;;  %3513 = vmatmul.mubr.f32.vlgmr.msra.gmra.mrb[22].mxu0 %v6974_v1 }
 0x1bc   :  { %5242 = vmatpush3.bf16.msra.mxu1 %v7000_v33 }
 0x1bd   :  { %5244 = vmatprep.subr.bf16.mxu1 %v7026_v22 }
 0x1c0   :  { %5246 = vmatpush3.bf16.msra.mxu1 %v7050_v10 }
 0x1c3   :  { %3617 = vmatmul.mubr.f32.vlgmr.msra.gmra.mrb[22].mxu1 %v6974_v1 }
 0x1cd   :  { %v4021_v44 = vpop.f32.mrb[10].mxu0 }
 0x1ce   :  { %v4022_v58 = vpop.f32.mrb[11].mxu0 }
 0x1cf   :  { %v4023_v34 = vadd.f32 %v4022_v58, %v4021_v44 }
 0x1d1   :  { %v1791_v2 = vadd.f32 %v4023_v34, %v1623_v59 }
 0x1d6   :  { %v4056_v51 = vpop.f32.mrb[10].mxu1 }
 0x1d7   :  { %v4057_v13 = vpop.f32.mrb[11].mxu1 }
 0x1d8   :  { %v4058_v29 = vadd.f32 %v4057_v13, %v4056_v51 }
 0x1da   :  { %v1895_v43 = vadd.f32 %v4058_v29, %v1791_v2 }
 0x1ed   :  { %v4091_v60 = vpop.f32.mrb[12].mxu0 }
 0x1ee   :  { %v4092_v49 = vpop.f32.mrb[13].mxu0 }
 0x1ef   :  { %v4093_v42 = vadd.f32 %v4092_v49, %v4091_v60 }
 0x1f1   :  { %v2007_v12 = vadd.f32 %v4093_v42, %v1895_v43 }
 0x1f6   :  { %v4126_v61 = vpop.f32.mrb[12].mxu1 }
 0x1f7   :  { %v4127_v33 = vpop.f32.mrb[13].mxu1 }
 0x1f8   :  { %v4128_v18 = vadd.f32 %v4127_v33, %v4126_v61 }
 0x1fa   :  { %v2239_v22 = vadd.f32 %v4128_v18, %v2007_v12 }
 0x20d   :  { %v4161_v35 = vpop.f32.mrb[14].mxu0 }
 0x20e   :  { %v4162_v10 = vpop.f32.mrb[15].mxu0 }
 0x20f   :  { %v4163_v19 = vadd.f32 %v4162_v10, %v4161_v35 }
 0x211   :  { %v2377_v1 = vadd.f32 %v4163_v19, %v2239_v22 }
 0x216   :  { %v4196_v4 = vpop.f32.mrb[14].mxu1 }
 0x217   :  { %v4197_v21 = vpop.f32.mrb[15].mxu1 }
 0x218   :  { %v4198_v48 = vadd.f32 %v4197_v21, %v4196_v4 }
 0x21a   :  { %v2485_v55 = vadd.f32 %v4198_v48, %v2377_v1 }
 0x22d   :  { %v4231_v63 = vpop.f32.mrb[16].mxu0 }
 0x22e   :  { %v4232_v3 = vpop.f32.mrb[17].mxu0 }
 0x22f   :  { %v4233_v28 = vadd.f32 %v4232_v3, %v4231_v63 }
 0x231   :  { %v2653_v17 = vadd.f32 %v4233_v28, %v2485_v55 }
 0x236   :  { %v4266_v32 = vpop.f32.mrb[16].mxu1 }
 0x237   :  { %v4267_v15 = vpop.f32.mrb[17].mxu1 }
 0x238   :  { %v4268_v54 = vadd.f32 %v4267_v15, %v4266_v32 }
 0x23a   :  { %v2757_v27 = vadd.f32 %v4268_v54, %v2653_v17 }
 0x24d   :  { %v4301_v23 = vpop.f32.mrb[18].mxu0 }
 0x24e   :  { %v4302_v36 = vpop.f32.mrb[19].mxu0 }
 0x24f   :  { %v4303_v39 = vadd.f32 %v4302_v36, %v4301_v23 }
 0x251   :  { %v2869_v20 = vadd.f32 %v4303_v39, %v2757_v27 }
 0x256   :  { %v4336_v46 = vpop.f32.mrb[18].mxu1 }
 0x257   :  { %v4337_v24 = vpop.f32.mrb[19].mxu1 }
 0x258   :  { %v4338_v45 = vadd.f32 %v4337_v24, %v4336_v46 }
 0x25a   :  { %v3101_v38 = vadd.f32 %v4338_v45, %v2869_v20 }
 0x26d   :  { %v4371_v26 = vpop.f32.mrb[20].mxu0 }
 0x26e   :  { %v4372_v37 = vpop.f32.mrb[21].mxu0 }
 0x26f   :  { %v4373_v9 = vadd.f32 %v4372_v37, %v4371_v26 }
 0x271   :  { %v3239_v57 = vadd.f32 %v4373_v9, %v3101_v38 }
 0x276   :  { %v4406_v53 = vpop.f32.mrb[20].mxu1 }
 0x277   :  { %v4407_v56 = vpop.f32.mrb[21].mxu1 }
 0x278   :  { %v4408_v7 = vadd.f32 %v4407_v56, %v4406_v53 }
 0x27a   :  { %v3347_v40 = vadd.f32 %v4408_v7, %v3239_v57 }
 0x28d   :  { %v4441_v30 = vpop.f32.mrb[22].mxu0 }
 0x28e   :  { %v4442_v47 = vpop.f32.mrb[23].mxu0 }
 0x28f   :  { %v4443_v8 = vadd.f32 %v4442_v47, %v4441_v30 }
 0x291   :  { %v3515_v41 = vadd.f32 %v4443_v8, %v3347_v40 }
 0x296   :  { %v4476_v0 = vpop.f32.mrb[22].mxu1 }
 0x297   :  { %v4477_v16 = vpop.f32.mrb[23].mxu1 }
 0x298   :  { %v4478_v6 = vadd.f32 %v4477_v16, %v4476_v0 }
 0x29a   :  { %v3619_v52 = vadd.f32 %v4478_v6, %v3515_v41 }
 0x29c   :  { %3622 = vst [vmem:[#allocation7] sm:$0xff] %v3619_v52 }
 0x29d   :  { %5307 = shalt.err (!%p5304_p6)
}
 0x29e   :  { %s5308_s10 = scalar_lea.hbm %s7213_s2, 128 }
 0x29f   :  { %p5309_p7 = scmp.ne.s32.totalorder %s7213_s2, %s5308_s10  ;;  %p5312_p8 = scmp.lt.u32.totalorder %s5308_s10, %s7213_s2 }
 0x2a1   :  { %p5314_p9 = pnand %p5312_p8, %p5309_p7 }
 0x2a3   :  { %5317 = shalt.err (!%p5314_p9)
}
 0x2a4   :  { %3632 = dma.vmem_to_hbm [thread:$0]  %s3630_s6, 128, %s7213_s2, [#allocation4]  }
 0x2a5   :  { %5322 = dma.done.wait [#allocation4], 128  }
 0x2a6   :  { %5323 = vsyncadd [#allocation4], 4294967168 }
 0x2a7   :  { %3636 = vsyncpa [#allocation3], 1 }
 0x2a8   :  { %3637 = vsyncpa [#allocation6], 1 }
 0x2a9   :  { %3638 = vsyncpa [#allocation4], 1 }

</bundles_post_ra>
